<compile_context>
chip_gen: v7x
topology: tpu7x:2x2x1
jax: 0.10.0
libtpu: 0.0.40
codegen_flags: <defaults>
</compile_context>

<pallas_src>
import functools

import jax
import jax.numpy as jnp
from jax import lax
from jax.experimental import pallas as pl
from jax.experimental.pallas import tpu as pltpu


# ---------------------------------------------------------------------------
# Fused Pallas kernel
# ---------------------------------------------------------------------------
def _full_spec(shape):
    n = len(shape)
    return pl.BlockSpec(shape, lambda i, _n=n: (0,) * _n)


def make_fused_mynet_kernel(S, B, I, H, num_layers, num_dir):
    """Build the fused MyNet kernel for a static configuration.

    Ref order: x (B*S, I) batch-major (row = b*S + t); then per layer:
      w_ih packed (in_dim, G) bf16, w_hh packed (Dh, G) bf16, b packed (1, G);
    then w_lin (1, Dh), b_lin (1, 1); out (B, 1).
    Dh = num_dir*H, G = 4*Dh.  Packed gate column layout is gate-major and
    direction-interleaved: [i_f,i_b, f_f,f_b, g_f,g_b, o_f,o_b], each H wide,
    so gate slices line up with the [fwd | bwd] layout of h/c.
    """
    Dh = num_dir * H
    G = 4 * Dh

    def kernel(*refs):
        it = iter(refs)
        x_ref = next(it)                                     # (B*S, I)
        layers = [(next(it), next(it), next(it))             # (w_ih, w_hh, b)
                  for _ in range(num_layers)]
        wlin_ref = next(it)                                  # (1, Dh)
        blin_ref = next(it)                                  # (1, 1)
        out_ref = next(it)                                   # (B, 1)

        if num_dir == 2:
            # Static lane mask selecting the forward-direction half of every
            # gate block (first H lanes of each 2H-wide gate block).
            col = lax.broadcasted_iota(jnp.int32, (B, G), 1)
            fwd_mask = (col % (2 * H)) < H

        def time_rows(gx, t, time_major):
            """Rows of gx belonging to time step t (static indices)."""
            if time_major:
                return gx[t * B:(t + 1) * B, :]
            # Layer-0 gx is batch-major: row b*S + t.
            return jnp.concatenate(
                [gx[b * S + t: b * S + t + 1, :] for b in range(B)], axis=0)

        x_val = x_ref[...].astype(jnp.float32)               # (B*S, I)
        time_major = False                                   # layer-0 row order
        acc = None

        for l in range(num_layers):
            wih_ref, whh_ref, b_ref = layers[l]
            last = (l == num_layers - 1)

            # Hoisted fused input projection for BOTH directions: one matmul.
            gx = jnp.dot(x_val.astype(jnp.bfloat16), wih_ref[...],
                         preferred_element_type=jnp.float32) + b_ref[...]

            # Per-step gate precursors (off the serial chain): forward half
            # from time s, backward half from time S-1-s.
            if num_dir == 2:
                gxt = [jnp.where(fwd_mask,
                                 time_rows(gx, s, time_major),
                                 time_rows(gx, S - 1 - s, time_major))
                       for s in range(S)]
            else:
                gxt = [time_rows(gx, s, time_major) for s in range(S)]

            whh = whh_ref[...]                               # (Dh, G) bf16
            h = jnp.zeros((B, Dh), jnp.float32)
            c = jnp.zeros((B, Dh), jnp.float32)
            acc = jnp.zeros((B, Dh), jnp.float32)
            hs = []

            for s in range(S):                               # fully unrolled
                g = gxt[s] + jnp.dot(h.astype(jnp.bfloat16), whh,
                                     preferred_element_type=jnp.float32)
                sig = jax.nn.sigmoid(g)                      # full-vreg EUP pass
                i_g = sig[:, 0 * Dh:1 * Dh]
                f_g = sig[:, 1 * Dh:2 * Dh]
                gg = jnp.tanh(g[:, 2 * Dh:3 * Dh])
                o_g = sig[:, 3 * Dh:4 * Dh]
                c = f_g * c + i_g * gg
                h = o_g * jnp.tanh(c)
                if last:
                    acc = acc + h                            # fused mean: sum_t h
                else:
                    hs.append(h)

            if not last:
                # Next layer's input, time-major rows [h_fwd(t) | h_bwd(t)],
                # kept entirely in registers (no VMEM scratch).
                if num_dir == 2:
                    rows = [jnp.concatenate([hs[t][:, 0:H],
                                             hs[S - 1 - t][:, H:2 * H]], axis=1)
                            for t in range(S)]
                else:
                    rows = hs
                x_val = jnp.concatenate(rows, axis=0)        # (S*B, Dh)
                time_major = True

        # Head: mean over time then Linear(Dh -> 1) as a VPU multiply + lane
        # reduction (no 1-wide MXU matmul).
        mean = acc * (1.0 / S)
        pred = jnp.sum(mean * wlin_ref[...], axis=1, keepdims=True) + blin_ref[...]
        out_ref[...] = pred.astype(out_ref.dtype)

    return kernel


# ---------------------------------------------------------------------------
# Full MyNet forward: single fused pallas_call
# ---------------------------------------------------------------------------
@functools.partial(jax.jit, static_argnums=(2, 3, 4))
def mynet_forward(x, params, hidden_size, num_layers, bidirectional):
    H = hidden_size
    num_dir = 2 if bidirectional else 1
    B, S, I = x.shape
    Dh = num_dir * H
    G = 4 * Dh

    # Contiguous collapse only (no host-side transpose); row = b*S + t.
    x_bm = x.reshape(B * S, I).astype(jnp.float32)

    inputs = [x_bm]
    for l in range(num_layers):
        ps = [params["lstm"][(l, d)] for d in range(num_dir)]
        wih_cols, whh_cols, b_cols = [], [], []
        for k in range(4):                                   # gates i, f, g, o
            for d in range(num_dir):
                p = ps[d]
                wih_cols.append(p["w_ih"][k * H:(k + 1) * H, :].T)   # (in_dim, H)
                blk = p["w_hh"][k * H:(k + 1) * H, :].T              # (H, H)
                if num_dir == 2:
                    zero = jnp.zeros((H, H), jnp.float32)
                    col = (jnp.concatenate([blk, zero], axis=0) if d == 0
                           else jnp.concatenate([zero, blk], axis=0))  # (2H, H)
                else:
                    col = blk
                whh_cols.append(col)
                b_cols.append((p["b_ih"] + p["b_hh"])[k * H:(k + 1) * H])
        inputs.append(jnp.concatenate(wih_cols, axis=1).astype(jnp.bfloat16))
        inputs.append(jnp.concatenate(whh_cols, axis=1).astype(jnp.bfloat16))
        inputs.append(jnp.concatenate(b_cols, axis=0).reshape(1, G))
    inputs.append(params["w_lin"].reshape(1, Dh))
    inputs.append(params["b_lin"].reshape(1, 1))

    kernel = make_fused_mynet_kernel(S, B, I, H, num_layers, num_dir)
    return pl.pallas_call(
        kernel,
        out_shape=jax.ShapeDtypeStruct((B, 1), jnp.float32),
        grid_spec=pltpu.PrefetchScalarGridSpec(
            num_scalar_prefetch=0,
            grid=(1,),
            in_specs=[_full_spec(a.shape) for a in inputs],
            out_specs=_full_spec((B, 1)),
        ),
        compiler_params=pltpu.CompilerParams(
            dimension_semantics=("arbitrary",)),
    )(*inputs)


# ---------------------------------------------------------------------------
# Pure-JAX reference (f32, for correctness check)
# ---------------------------------------------------------------------------
def _lstm_layer_ref(x_tm, w_ih, w_hh, b, H):
    B = x_tm.shape[1]

    def step(carry, x_t):
        h, c = carry
        gates = x_t @ w_ih.T + h @ w_hh.T + b
        i = jax.nn.sigmoid(gates[:, 0:H])
        f = jax.nn.sigmoid(gates[:, H:2 * H])
        g = jnp.tanh(gates[:, 2 * H:3 * H])
        o = jax.nn.sigmoid(gates[:, 3 * H:4 * H])
        c = f * c + i * g
        h = o * jnp.tanh(c)
        return (h, c), h

    init = (jnp.zeros((B, H), jnp.float32), jnp.zeros((B, H), jnp.float32))
    _, hs = lax.scan(step, init, x_tm)
    return hs


def mynet_reference(x, params, hidden_size, num_layers, bidirectional):
    H = hidden_size
    num_dir = 2 if bidirectional else 1
    seq = jnp.transpose(x, (1, 0, 2)).astype(jnp.float32)
    for layer in range(num_layers):
        outs = []
        for d in range(num_dir):
            p = params["lstm"][(layer, d)]
            b = p["b_ih"] + p["b_hh"]
            inp = seq if d == 0 else jnp.flip(seq, axis=0)
            out = _lstm_layer_ref(inp, p["w_ih"], p["w_hh"], b, H)
            if d == 1:
                out = jnp.flip(out, axis=0)
            outs.append(out)
        seq = jnp.concatenate(outs, axis=-1) if num_dir == 2 else outs[0]
    mean = jnp.mean(seq, axis=0)                       # (B, D)
    return mean @ params["w_lin"].T + params["b_lin"]  # (B, 1)


# ---------------------------------------------------------------------------
# Deterministic parameter init (shapes follow nn.LSTM / nn.Linear)
# ---------------------------------------------------------------------------
def init_params(key, input_size, hidden_size, num_layers, bidirectional):
    H = hidden_size
    num_dir = 2 if bidirectional else 1
    k = 1.0 / float(jnp.sqrt(jnp.float32(H)))
    params = {"lstm": {}}
    for layer in range(num_layers):
        in_dim = input_size if layer == 0 else H * num_dir
        for d in range(num_dir):
            key, k1, k2, k3, k4 = jax.random.split(key, 5)
            params["lstm"][(layer, d)] = {
                "w_ih": jax.random.uniform(k1, (4 * H, in_dim), jnp.float32, -k, k),
                "w_hh": jax.random.uniform(k2, (4 * H, H), jnp.float32, -k, k),
                "b_ih": jax.random.uniform(k3, (4 * H,), jnp.float32, -k, k),
                "b_hh": jax.random.uniform(k4, (4 * H,), jnp.float32, -k, k),
            }
    D = H * num_dir
    kl = 1.0 / float(jnp.sqrt(jnp.float32(D)))
    key, k1, k2 = jax.random.split(key, 3)
    params["w_lin"] = jax.random.uniform(k1, (1, D), jnp.float32, -kl, kl)
    params["b_lin"] = jax.random.uniform(k2, (1,), jnp.float32, -kl, kl)
    return params


if __name__ == "__main__":
    INPUT_SIZE = 4        # fixed by the module
    HIDDEN_SIZE = 32      # args.hidden_size
    NUM_LAYERS = 2        # args.num_layers
    BIDIRECTIONAL = True  # args.is_bidirectional
    B, S = 2, 8

    key = jax.random.PRNGKey(0)
    kx, kp = jax.random.split(key)
    x = jax.random.normal(kx, (B, S, INPUT_SIZE), jnp.float32)
    params = init_params(kp, INPUT_SIZE, HIDDEN_SIZE, NUM_LAYERS, BIDIRECTIONAL)

    pred = mynet_forward(x, params, HIDDEN_SIZE, NUM_LAYERS, BIDIRECTIONAL)
    pred = jax.block_until_ready(pred)

    ref = mynet_reference(x, params, HIDDEN_SIZE, NUM_LAYERS, BIDIRECTIONAL)
    assert pred.shape == (B, 1), pred.shape
    # bf16 MXU operands (weights + activation casts) vs. f32 reference:
    # tolerance loosened accordingly.
    assert jnp.allclose(pred, ref, atol=2e-2, rtol=2e-2), (pred, ref)
    print("KERNEL_OK")
</pallas_src>

<mosaic_0001>
module attributes {stable_mosaic.version = 11 : i64} {
  func.func @kernel(%arg0: i32, %arg1: memref<16x4xf32, #tpu.memory_space<vmem>>, %arg2: memref<4x256xbf16, #tpu.memory_space<vmem>>, %arg3: memref<64x256xbf16, #tpu.memory_space<vmem>>, %arg4: memref<1x256xf32, #tpu.memory_space<vmem>>, %arg5: memref<64x256xbf16, #tpu.memory_space<vmem>>, %arg6: memref<64x256xbf16, #tpu.memory_space<vmem>>, %arg7: memref<1x256xf32, #tpu.memory_space<vmem>>, %arg8: memref<1x64xf32, #tpu.memory_space<vmem>>, %arg9: memref<1x1xf32, #tpu.memory_space<vmem>>, %arg10: memref<2x1xf32, #tpu.memory_space<vmem>>) attributes {dimension_semantics = [#tpu.dimension_semantics<arbitrary>], iteration_bounds = array<i64: 1>, scalar_prefetch = 0 : i64, scratch_operands = 0 : i64, tpu.core_type = #tpu.core_type<tc>, window_params = [{pipeline_mode = #tpu.pipeline_mode<synchronous>, transform_indices = @transform_0, window_bounds = array<i64: 16, 4>}, {pipeline_mode = #tpu.pipeline_mode<synchronous>, transform_indices = @transform_1, window_bounds = array<i64: 4, 256>}, {pipeline_mode = #tpu.pipeline_mode<synchronous>, transform_indices = @transform_2, window_bounds = array<i64: 64, 256>}, {pipeline_mode = #tpu.pipeline_mode<synchronous>, transform_indices = @transform_3, window_bounds = array<i64: 1, 256>}, {pipeline_mode = #tpu.pipeline_mode<synchronous>, transform_indices = @transform_4, window_bounds = array<i64: 64, 256>}, {pipeline_mode = #tpu.pipeline_mode<synchronous>, transform_indices = @transform_5, window_bounds = array<i64: 64, 256>}, {pipeline_mode = #tpu.pipeline_mode<synchronous>, transform_indices = @transform_6, window_bounds = array<i64: 1, 256>}, {pipeline_mode = #tpu.pipeline_mode<synchronous>, transform_indices = @transform_7, window_bounds = array<i64: 1, 64>}, {pipeline_mode = #tpu.pipeline_mode<synchronous>, transform_indices = @transform_8, window_bounds = array<i64: 1, 1>}, {pipeline_mode = #tpu.pipeline_mode<synchronous>, transform_indices = @transform_9, window_bounds = array<i64: 2, 1>}]} {
    %0 = tpu.iota {dimensions = array<i32: 1>} : vector<2x256xi32>
    %c64_i32 = arith.constant 64 : i32
    %c0_i32 = arith.constant 0 : i32
    %1 = arith.cmpi eq, %c64_i32, %c0_i32 : i32
    %c1_i32 = arith.constant 1 : i32
    %2 = arith.select %1, %c1_i32, %c64_i32 : i32
    %3 = vector.broadcast %2 : i32 to vector<2x256xi32>
    %4 = arith.remsi %0, %3 : vector<2x256xi32>
    %c0_i32_0 = arith.constant 0 : i32
    %5 = vector.broadcast %c0_i32_0 : i32 to vector<2x256xi32>
    %6 = arith.cmpi ne, %4, %5 : vector<2x256xi32>
    %c0_i32_1 = arith.constant 0 : i32
    %7 = vector.broadcast %c0_i32_1 : i32 to vector<2x256xi32>
    %8 = arith.cmpi slt, %4, %7 : vector<2x256xi32>
    %c0_i32_2 = arith.constant 0 : i32
    %9 = arith.cmpi slt, %2, %c0_i32_2 : i32
    %10 = vector.broadcast %9 : i1 to vector<2x256xi1>
    %11 = vector.broadcast %10 : vector<2x256xi1> to vector<2x256xi1>
    %12 = arith.xori %8, %11 : vector<2x256xi1>
    %13 = arith.andi %12, %6 : vector<2x256xi1>
    %14 = vector.broadcast %2 : i32 to vector<2x256xi32>
    %15 = arith.addi %4, %14 : vector<2x256xi32>
    %16 = arith.select %13, %15, %4 : vector<2x256xi1>, vector<2x256xi32>
    %c32_i32 = arith.constant 32 : i32
    %17 = vector.broadcast %c32_i32 : i32 to vector<2x256xi32>
    %18 = arith.cmpi slt, %16, %17 : vector<2x256xi32>
    %c0 = arith.constant 0 : index
    %c0_3 = arith.constant 0 : index
    %19 = vector.load %arg1[%c0, %c0_3] : memref<16x4xf32, #tpu.memory_space<vmem>>, vector<16x4xf32>
    %20 = arith.truncf %19 : vector<16x4xf32> to vector<16x4xbf16>
    %c0_4 = arith.constant 0 : index
    %c0_5 = arith.constant 0 : index
    %21 = vector.load %arg2[%c0_4, %c0_5] : memref<4x256xbf16, #tpu.memory_space<vmem>>, vector<4x256xbf16>
    %cst = arith.constant dense<0.000000e+00> : vector<16x256xf32>
    %22 = tpu.matmul %20, %21, %cst {dimension_numbers = #tpu.dot_dimension_numbers<[1], [0], [0], [1], [0, 0, 1, 1], [], []>} : vector<16x4xbf16>, vector<4x256xbf16>, vector<16x256xf32> -> vector<16x256xf32>
    %c0_6 = arith.constant 0 : index
    %c0_7 = arith.constant 0 : index
    %23 = vector.load %arg4[%c0_6, %c0_7] : memref<1x256xf32, #tpu.memory_space<vmem>>, vector<1x256xf32>
    %24 = vector.broadcast %23 : vector<1x256xf32> to vector<16x256xf32>
    %25 = arith.addf %22, %24 : vector<16x256xf32>
    %26 = vector.extract_strided_slice %25 {offsets = [0, 0], sizes = [1, 256], strides = [1, 1]} : vector<16x256xf32> to vector<1x256xf32>
    %27 = vector.extract_strided_slice %25 {offsets = [8, 0], sizes = [1, 256], strides = [1, 1]} : vector<16x256xf32> to vector<1x256xf32>
    %28 = tpu.concatenate %26, %27 in 0 : vector<1x256xf32>, vector<1x256xf32> -> vector<2x256xf32>
    %29 = vector.extract_strided_slice %25 {offsets = [7, 0], sizes = [1, 256], strides = [1, 1]} : vector<16x256xf32> to vector<1x256xf32>
    %30 = vector.extract_strided_slice %25 {offsets = [15, 0], sizes = [1, 256], strides = [1, 1]} : vector<16x256xf32> to vector<1x256xf32>
    %31 = tpu.concatenate %29, %30 in 0 : vector<1x256xf32>, vector<1x256xf32> -> vector<2x256xf32>
    %32 = arith.select %18, %28, %31 : vector<2x256xi1>, vector<2x256xf32>
    %33 = vector.extract_strided_slice %25 {offsets = [1, 0], sizes = [1, 256], strides = [1, 1]} : vector<16x256xf32> to vector<1x256xf32>
    %34 = vector.extract_strided_slice %25 {offsets = [9, 0], sizes = [1, 256], strides = [1, 1]} : vector<16x256xf32> to vector<1x256xf32>
    %35 = tpu.concatenate %33, %34 in 0 : vector<1x256xf32>, vector<1x256xf32> -> vector<2x256xf32>
    %36 = vector.extract_strided_slice %25 {offsets = [6, 0], sizes = [1, 256], strides = [1, 1]} : vector<16x256xf32> to vector<1x256xf32>
    %37 = vector.extract_strided_slice %25 {offsets = [14, 0], sizes = [1, 256], strides = [1, 1]} : vector<16x256xf32> to vector<1x256xf32>
    %38 = tpu.concatenate %36, %37 in 0 : vector<1x256xf32>, vector<1x256xf32> -> vector<2x256xf32>
    %39 = arith.select %18, %35, %38 : vector<2x256xi1>, vector<2x256xf32>
    %40 = vector.extract_strided_slice %25 {offsets = [2, 0], sizes = [1, 256], strides = [1, 1]} : vector<16x256xf32> to vector<1x256xf32>
    %41 = vector.extract_strided_slice %25 {offsets = [10, 0], sizes = [1, 256], strides = [1, 1]} : vector<16x256xf32> to vector<1x256xf32>
    %42 = tpu.concatenate %40, %41 in 0 : vector<1x256xf32>, vector<1x256xf32> -> vector<2x256xf32>
    %43 = vector.extract_strided_slice %25 {offsets = [5, 0], sizes = [1, 256], strides = [1, 1]} : vector<16x256xf32> to vector<1x256xf32>
    %44 = vector.extract_strided_slice %25 {offsets = [13, 0], sizes = [1, 256], strides = [1, 1]} : vector<16x256xf32> to vector<1x256xf32>
    %45 = tpu.concatenate %43, %44 in 0 : vector<1x256xf32>, vector<1x256xf32> -> vector<2x256xf32>
    %46 = arith.select %18, %42, %45 : vector<2x256xi1>, vector<2x256xf32>
    %47 = vector.extract_strided_slice %25 {offsets = [3, 0], sizes = [1, 256], strides = [1, 1]} : vector<16x256xf32> to vector<1x256xf32>
    %48 = vector.extract_strided_slice %25 {offsets = [11, 0], sizes = [1, 256], strides = [1, 1]} : vector<16x256xf32> to vector<1x256xf32>
    %49 = tpu.concatenate %47, %48 in 0 : vector<1x256xf32>, vector<1x256xf32> -> vector<2x256xf32>
    %50 = vector.extract_strided_slice %25 {offsets = [4, 0], sizes = [1, 256], strides = [1, 1]} : vector<16x256xf32> to vector<1x256xf32>
    %51 = vector.extract_strided_slice %25 {offsets = [12, 0], sizes = [1, 256], strides = [1, 1]} : vector<16x256xf32> to vector<1x256xf32>
    %52 = tpu.concatenate %50, %51 in 0 : vector<1x256xf32>, vector<1x256xf32> -> vector<2x256xf32>
    %53 = arith.select %18, %49, %52 : vector<2x256xi1>, vector<2x256xf32>
    %54 = vector.extract_strided_slice %25 {offsets = [4, 0], sizes = [1, 256], strides = [1, 1]} : vector<16x256xf32> to vector<1x256xf32>
    %55 = vector.extract_strided_slice %25 {offsets = [12, 0], sizes = [1, 256], strides = [1, 1]} : vector<16x256xf32> to vector<1x256xf32>
    %56 = tpu.concatenate %54, %55 in 0 : vector<1x256xf32>, vector<1x256xf32> -> vector<2x256xf32>
    %57 = vector.extract_strided_slice %25 {offsets = [3, 0], sizes = [1, 256], strides = [1, 1]} : vector<16x256xf32> to vector<1x256xf32>
    %58 = vector.extract_strided_slice %25 {offsets = [11, 0], sizes = [1, 256], strides = [1, 1]} : vector<16x256xf32> to vector<1x256xf32>
    %59 = tpu.concatenate %57, %58 in 0 : vector<1x256xf32>, vector<1x256xf32> -> vector<2x256xf32>
    %60 = arith.select %18, %56, %59 : vector<2x256xi1>, vector<2x256xf32>
    %61 = vector.extract_strided_slice %25 {offsets = [5, 0], sizes = [1, 256], strides = [1, 1]} : vector<16x256xf32> to vector<1x256xf32>
    %62 = vector.extract_strided_slice %25 {offsets = [13, 0], sizes = [1, 256], strides = [1, 1]} : vector<16x256xf32> to vector<1x256xf32>
    %63 = tpu.concatenate %61, %62 in 0 : vector<1x256xf32>, vector<1x256xf32> -> vector<2x256xf32>
    %64 = vector.extract_strided_slice %25 {offsets = [2, 0], sizes = [1, 256], strides = [1, 1]} : vector<16x256xf32> to vector<1x256xf32>
    %65 = vector.extract_strided_slice %25 {offsets = [10, 0], sizes = [1, 256], strides = [1, 1]} : vector<16x256xf32> to vector<1x256xf32>
    %66 = tpu.concatenate %64, %65 in 0 : vector<1x256xf32>, vector<1x256xf32> -> vector<2x256xf32>
    %67 = arith.select %18, %63, %66 : vector<2x256xi1>, vector<2x256xf32>
    %68 = vector.extract_strided_slice %25 {offsets = [6, 0], sizes = [1, 256], strides = [1, 1]} : vector<16x256xf32> to vector<1x256xf32>
    %69 = vector.extract_strided_slice %25 {offsets = [14, 0], sizes = [1, 256], strides = [1, 1]} : vector<16x256xf32> to vector<1x256xf32>
    %70 = tpu.concatenate %68, %69 in 0 : vector<1x256xf32>, vector<1x256xf32> -> vector<2x256xf32>
    %71 = vector.extract_strided_slice %25 {offsets = [1, 0], sizes = [1, 256], strides = [1, 1]} : vector<16x256xf32> to vector<1x256xf32>
    %72 = vector.extract_strided_slice %25 {offsets = [9, 0], sizes = [1, 256], strides = [1, 1]} : vector<16x256xf32> to vector<1x256xf32>
    %73 = tpu.concatenate %71, %72 in 0 : vector<1x256xf32>, vector<1x256xf32> -> vector<2x256xf32>
    %74 = arith.select %18, %70, %73 : vector<2x256xi1>, vector<2x256xf32>
    %75 = vector.extract_strided_slice %25 {offsets = [7, 0], sizes = [1, 256], strides = [1, 1]} : vector<16x256xf32> to vector<1x256xf32>
    %76 = vector.extract_strided_slice %25 {offsets = [15, 0], sizes = [1, 256], strides = [1, 1]} : vector<16x256xf32> to vector<1x256xf32>
    %77 = tpu.concatenate %75, %76 in 0 : vector<1x256xf32>, vector<1x256xf32> -> vector<2x256xf32>
    %78 = vector.extract_strided_slice %25 {offsets = [0, 0], sizes = [1, 256], strides = [1, 1]} : vector<16x256xf32> to vector<1x256xf32>
    %79 = vector.extract_strided_slice %25 {offsets = [8, 0], sizes = [1, 256], strides = [1, 1]} : vector<16x256xf32> to vector<1x256xf32>
    %80 = tpu.concatenate %78, %79 in 0 : vector<1x256xf32>, vector<1x256xf32> -> vector<2x256xf32>
    %81 = arith.select %18, %77, %80 : vector<2x256xi1>, vector<2x256xf32>
    %c0_8 = arith.constant 0 : index
    %c0_9 = arith.constant 0 : index
    %82 = vector.load %arg3[%c0_8, %c0_9] : memref<64x256xbf16, #tpu.memory_space<vmem>>, vector<64x256xbf16>
    %cst_10 = arith.constant 0.000000e+00 : f32
    %83 = vector.broadcast %cst_10 : f32 to vector<2x64xf32>
    %cst_11 = arith.constant 0.000000e+00 : f32
    %84 = vector.broadcast %cst_11 : f32 to vector<2x64xf32>
    %85 = arith.truncf %83 : vector<2x64xf32> to vector<2x64xbf16>
    %cst_12 = arith.constant dense<0.000000e+00> : vector<2x256xf32>
    %86 = tpu.matmul %85, %82, %cst_12 {dimension_numbers = #tpu.dot_dimension_numbers<[1], [0], [0], [1], [0, 0, 1, 1], [], []>} : vector<2x64xbf16>, vector<64x256xbf16>, vector<2x256xf32> -> vector<2x256xf32>
    %87 = arith.addf %32, %86 : vector<2x256xf32>
    %88 = arith.negf %87 : vector<2x256xf32>
    %89 = math.exp %88 : vector<2x256xf32>
    %cst_13 = arith.constant 1.000000e+00 : f32
    %90 = vector.broadcast %cst_13 : f32 to vector<2x256xf32>
    %91 = arith.addf %90, %89 : vector<2x256xf32>
    %92 = arith.divf %90, %91 : vector<2x256xf32>
    %93 = vector.extract_strided_slice %92 {offsets = [0, 0], sizes = [2, 64], strides = [1, 1]} : vector<2x256xf32> to vector<2x64xf32>
    %94 = vector.extract_strided_slice %92 {offsets = [0, 64], sizes = [2, 64], strides = [1, 1]} : vector<2x256xf32> to vector<2x64xf32>
    %95 = vector.extract_strided_slice %87 {offsets = [0, 128], sizes = [2, 64], strides = [1, 1]} : vector<2x256xf32> to vector<2x64xf32>
    %96 = math.tanh %95 : vector<2x64xf32>
    %97 = vector.extract_strided_slice %92 {offsets = [0, 192], sizes = [2, 64], strides = [1, 1]} : vector<2x256xf32> to vector<2x64xf32>
    %98 = arith.mulf %94, %84 : vector<2x64xf32>
    %99 = arith.mulf %93, %96 : vector<2x64xf32>
    %100 = arith.addf %98, %99 : vector<2x64xf32>
    %101 = math.tanh %100 : vector<2x64xf32>
    %102 = arith.mulf %97, %101 : vector<2x64xf32>
    %103 = arith.truncf %102 : vector<2x64xf32> to vector<2x64xbf16>
    %cst_14 = arith.constant dense<0.000000e+00> : vector<2x256xf32>
    %104 = tpu.matmul %103, %82, %cst_14 {dimension_numbers = #tpu.dot_dimension_numbers<[1], [0], [0], [1], [0, 0, 1, 1], [], []>} : vector<2x64xbf16>, vector<64x256xbf16>, vector<2x256xf32> -> vector<2x256xf32>
    %105 = arith.addf %39, %104 : vector<2x256xf32>
    %106 = arith.negf %105 : vector<2x256xf32>
    %107 = math.exp %106 : vector<2x256xf32>
    %cst_15 = arith.constant 1.000000e+00 : f32
    %108 = vector.broadcast %cst_15 : f32 to vector<2x256xf32>
    %109 = arith.addf %108, %107 : vector<2x256xf32>
    %110 = arith.divf %108, %109 : vector<2x256xf32>
    %111 = vector.extract_strided_slice %110 {offsets = [0, 0], sizes = [2, 64], strides = [1, 1]} : vector<2x256xf32> to vector<2x64xf32>
    %112 = vector.extract_strided_slice %110 {offsets = [0, 64], sizes = [2, 64], strides = [1, 1]} : vector<2x256xf32> to vector<2x64xf32>
    %113 = vector.extract_strided_slice %105 {offsets = [0, 128], sizes = [2, 64], strides = [1, 1]} : vector<2x256xf32> to vector<2x64xf32>
    %114 = math.tanh %113 : vector<2x64xf32>
    %115 = vector.extract_strided_slice %110 {offsets = [0, 192], sizes = [2, 64], strides = [1, 1]} : vector<2x256xf32> to vector<2x64xf32>
    %116 = arith.mulf %112, %100 : vector<2x64xf32>
    %117 = arith.mulf %111, %114 : vector<2x64xf32>
    %118 = arith.addf %116, %117 : vector<2x64xf32>
    %119 = math.tanh %118 : vector<2x64xf32>
    %120 = arith.mulf %115, %119 : vector<2x64xf32>
    %121 = arith.truncf %120 : vector<2x64xf32> to vector<2x64xbf16>
    %cst_16 = arith.constant dense<0.000000e+00> : vector<2x256xf32>
    %122 = tpu.matmul %121, %82, %cst_16 {dimension_numbers = #tpu.dot_dimension_numbers<[1], [0], [0], [1], [0, 0, 1, 1], [], []>} : vector<2x64xbf16>, vector<64x256xbf16>, vector<2x256xf32> -> vector<2x256xf32>
    %123 = arith.addf %46, %122 : vector<2x256xf32>
    %124 = arith.negf %123 : vector<2x256xf32>
    %125 = math.exp %124 : vector<2x256xf32>
    %cst_17 = arith.constant 1.000000e+00 : f32
    %126 = vector.broadcast %cst_17 : f32 to vector<2x256xf32>
    %127 = arith.addf %126, %125 : vector<2x256xf32>
    %128 = arith.divf %126, %127 : vector<2x256xf32>
    %129 = vector.extract_strided_slice %128 {offsets = [0, 0], sizes = [2, 64], strides = [1, 1]} : vector<2x256xf32> to vector<2x64xf32>
    %130 = vector.extract_strided_slice %128 {offsets = [0, 64], sizes = [2, 64], strides = [1, 1]} : vector<2x256xf32> to vector<2x64xf32>
    %131 = vector.extract_strided_slice %123 {offsets = [0, 128], sizes = [2, 64], strides = [1, 1]} : vector<2x256xf32> to vector<2x64xf32>
    %132 = math.tanh %131 : vector<2x64xf32>
    %133 = vector.extract_strided_slice %128 {offsets = [0, 192], sizes = [2, 64], strides = [1, 1]} : vector<2x256xf32> to vector<2x64xf32>
    %134 = arith.mulf %130, %118 : vector<2x64xf32>
    %135 = arith.mulf %129, %132 : vector<2x64xf32>
    %136 = arith.addf %134, %135 : vector<2x64xf32>
    %137 = math.tanh %136 : vector<2x64xf32>
    %138 = arith.mulf %133, %137 : vector<2x64xf32>
    %139 = arith.truncf %138 : vector<2x64xf32> to vector<2x64xbf16>
    %cst_18 = arith.constant dense<0.000000e+00> : vector<2x256xf32>
    %140 = tpu.matmul %139, %82, %cst_18 {dimension_numbers = #tpu.dot_dimension_numbers<[1], [0], [0], [1], [0, 0, 1, 1], [], []>} : vector<2x64xbf16>, vector<64x256xbf16>, vector<2x256xf32> -> vector<2x256xf32>
    %141 = arith.addf %53, %140 : vector<2x256xf32>
    %142 = arith.negf %141 : vector<2x256xf32>
    %143 = math.exp %142 : vector<2x256xf32>
    %cst_19 = arith.constant 1.000000e+00 : f32
    %144 = vector.broadcast %cst_19 : f32 to vector<2x256xf32>
    %145 = arith.addf %144, %143 : vector<2x256xf32>
    %146 = arith.divf %144, %145 : vector<2x256xf32>
    %147 = vector.extract_strided_slice %146 {offsets = [0, 0], sizes = [2, 64], strides = [1, 1]} : vector<2x256xf32> to vector<2x64xf32>
    %148 = vector.extract_strided_slice %146 {offsets = [0, 64], sizes = [2, 64], strides = [1, 1]} : vector<2x256xf32> to vector<2x64xf32>
    %149 = vector.extract_strided_slice %141 {offsets = [0, 128], sizes = [2, 64], strides = [1, 1]} : vector<2x256xf32> to vector<2x64xf32>
    %150 = math.tanh %149 : vector<2x64xf32>
    %151 = vector.extract_strided_slice %146 {offsets = [0, 192], sizes = [2, 64], strides = [1, 1]} : vector<2x256xf32> to vector<2x64xf32>
    %152 = arith.mulf %148, %136 : vector<2x64xf32>
    %153 = arith.mulf %147, %150 : vector<2x64xf32>
    %154 = arith.addf %152, %153 : vector<2x64xf32>
    %155 = math.tanh %154 : vector<2x64xf32>
    %156 = arith.mulf %151, %155 : vector<2x64xf32>
    %157 = arith.truncf %156 : vector<2x64xf32> to vector<2x64xbf16>
    %cst_20 = arith.constant dense<0.000000e+00> : vector<2x256xf32>
    %158 = tpu.matmul %157, %82, %cst_20 {dimension_numbers = #tpu.dot_dimension_numbers<[1], [0], [0], [1], [0, 0, 1, 1], [], []>} : vector<2x64xbf16>, vector<64x256xbf16>, vector<2x256xf32> -> vector<2x256xf32>
    %159 = arith.addf %60, %158 : vector<2x256xf32>
    %160 = arith.negf %159 : vector<2x256xf32>
    %161 = math.exp %160 : vector<2x256xf32>
    %cst_21 = arith.constant 1.000000e+00 : f32
    %162 = vector.broadcast %cst_21 : f32 to vector<2x256xf32>
    %163 = arith.addf %162, %161 : vector<2x256xf32>
    %164 = arith.divf %162, %163 : vector<2x256xf32>
    %165 = vector.extract_strided_slice %164 {offsets = [0, 0], sizes = [2, 64], strides = [1, 1]} : vector<2x256xf32> to vector<2x64xf32>
    %166 = vector.extract_strided_slice %164 {offsets = [0, 64], sizes = [2, 64], strides = [1, 1]} : vector<2x256xf32> to vector<2x64xf32>
    %167 = vector.extract_strided_slice %159 {offsets = [0, 128], sizes = [2, 64], strides = [1, 1]} : vector<2x256xf32> to vector<2x64xf32>
    %168 = math.tanh %167 : vector<2x64xf32>
    %169 = vector.extract_strided_slice %164 {offsets = [0, 192], sizes = [2, 64], strides = [1, 1]} : vector<2x256xf32> to vector<2x64xf32>
    %170 = arith.mulf %166, %154 : vector<2x64xf32>
    %171 = arith.mulf %165, %168 : vector<2x64xf32>
    %172 = arith.addf %170, %171 : vector<2x64xf32>
    %173 = math.tanh %172 : vector<2x64xf32>
    %174 = arith.mulf %169, %173 : vector<2x64xf32>
    %175 = arith.truncf %174 : vector<2x64xf32> to vector<2x64xbf16>
    %cst_22 = arith.constant dense<0.000000e+00> : vector<2x256xf32>
    %176 = tpu.matmul %175, %82, %cst_22 {dimension_numbers = #tpu.dot_dimension_numbers<[1], [0], [0], [1], [0, 0, 1, 1], [], []>} : vector<2x64xbf16>, vector<64x256xbf16>, vector<2x256xf32> -> vector<2x256xf32>
    %177 = arith.addf %67, %176 : vector<2x256xf32>
    %178 = arith.negf %177 : vector<2x256xf32>
    %179 = math.exp %178 : vector<2x256xf32>
    %cst_23 = arith.constant 1.000000e+00 : f32
    %180 = vector.broadcast %cst_23 : f32 to vector<2x256xf32>
    %181 = arith.addf %180, %179 : vector<2x256xf32>
    %182 = arith.divf %180, %181 : vector<2x256xf32>
    %183 = vector.extract_strided_slice %182 {offsets = [0, 0], sizes = [2, 64], strides = [1, 1]} : vector<2x256xf32> to vector<2x64xf32>
    %184 = vector.extract_strided_slice %182 {offsets = [0, 64], sizes = [2, 64], strides = [1, 1]} : vector<2x256xf32> to vector<2x64xf32>
    %185 = vector.extract_strided_slice %177 {offsets = [0, 128], sizes = [2, 64], strides = [1, 1]} : vector<2x256xf32> to vector<2x64xf32>
    %186 = math.tanh %185 : vector<2x64xf32>
    %187 = vector.extract_strided_slice %182 {offsets = [0, 192], sizes = [2, 64], strides = [1, 1]} : vector<2x256xf32> to vector<2x64xf32>
    %188 = arith.mulf %184, %172 : vector<2x64xf32>
    %189 = arith.mulf %183, %186 : vector<2x64xf32>
    %190 = arith.addf %188, %189 : vector<2x64xf32>
    %191 = math.tanh %190 : vector<2x64xf32>
    %192 = arith.mulf %187, %191 : vector<2x64xf32>
    %193 = arith.truncf %192 : vector<2x64xf32> to vector<2x64xbf16>
    %cst_24 = arith.constant dense<0.000000e+00> : vector<2x256xf32>
    %194 = tpu.matmul %193, %82, %cst_24 {dimension_numbers = #tpu.dot_dimension_numbers<[1], [0], [0], [1], [0, 0, 1, 1], [], []>} : vector<2x64xbf16>, vector<64x256xbf16>, vector<2x256xf32> -> vector<2x256xf32>
    %195 = arith.addf %74, %194 : vector<2x256xf32>
    %196 = arith.negf %195 : vector<2x256xf32>
    %197 = math.exp %196 : vector<2x256xf32>
    %cst_25 = arith.constant 1.000000e+00 : f32
    %198 = vector.broadcast %cst_25 : f32 to vector<2x256xf32>
    %199 = arith.addf %198, %197 : vector<2x256xf32>
    %200 = arith.divf %198, %199 : vector<2x256xf32>
    %201 = vector.extract_strided_slice %200 {offsets = [0, 0], sizes = [2, 64], strides = [1, 1]} : vector<2x256xf32> to vector<2x64xf32>
    %202 = vector.extract_strided_slice %200 {offsets = [0, 64], sizes = [2, 64], strides = [1, 1]} : vector<2x256xf32> to vector<2x64xf32>
    %203 = vector.extract_strided_slice %195 {offsets = [0, 128], sizes = [2, 64], strides = [1, 1]} : vector<2x256xf32> to vector<2x64xf32>
    %204 = math.tanh %203 : vector<2x64xf32>
    %205 = vector.extract_strided_slice %200 {offsets = [0, 192], sizes = [2, 64], strides = [1, 1]} : vector<2x256xf32> to vector<2x64xf32>
    %206 = arith.mulf %202, %190 : vector<2x64xf32>
    %207 = arith.mulf %201, %204 : vector<2x64xf32>
    %208 = arith.addf %206, %207 : vector<2x64xf32>
    %209 = math.tanh %208 : vector<2x64xf32>
    %210 = arith.mulf %205, %209 : vector<2x64xf32>
    %211 = arith.truncf %210 : vector<2x64xf32> to vector<2x64xbf16>
    %cst_26 = arith.constant dense<0.000000e+00> : vector<2x256xf32>
    %212 = tpu.matmul %211, %82, %cst_26 {dimension_numbers = #tpu.dot_dimension_numbers<[1], [0], [0], [1], [0, 0, 1, 1], [], []>} : vector<2x64xbf16>, vector<64x256xbf16>, vector<2x256xf32> -> vector<2x256xf32>
    %213 = arith.addf %81, %212 : vector<2x256xf32>
    %214 = arith.negf %213 : vector<2x256xf32>
    %215 = math.exp %214 : vector<2x256xf32>
    %cst_27 = arith.constant 1.000000e+00 : f32
    %216 = vector.broadcast %cst_27 : f32 to vector<2x256xf32>
    %217 = arith.addf %216, %215 : vector<2x256xf32>
    %218 = arith.divf %216, %217 : vector<2x256xf32>
    %219 = vector.extract_strided_slice %218 {offsets = [0, 0], sizes = [2, 64], strides = [1, 1]} : vector<2x256xf32> to vector<2x64xf32>
    %220 = vector.extract_strided_slice %218 {offsets = [0, 64], sizes = [2, 64], strides = [1, 1]} : vector<2x256xf32> to vector<2x64xf32>
    %221 = vector.extract_strided_slice %213 {offsets = [0, 128], sizes = [2, 64], strides = [1, 1]} : vector<2x256xf32> to vector<2x64xf32>
    %222 = math.tanh %221 : vector<2x64xf32>
    %223 = vector.extract_strided_slice %218 {offsets = [0, 192], sizes = [2, 64], strides = [1, 1]} : vector<2x256xf32> to vector<2x64xf32>
    %224 = arith.mulf %220, %208 : vector<2x64xf32>
    %225 = arith.mulf %219, %222 : vector<2x64xf32>
    %226 = arith.addf %224, %225 : vector<2x64xf32>
    %227 = math.tanh %226 : vector<2x64xf32>
    %228 = arith.mulf %223, %227 : vector<2x64xf32>
    %229 = vector.extract_strided_slice %102 {offsets = [0, 0], sizes = [2, 32], strides = [1, 1]} : vector<2x64xf32> to vector<2x32xf32>
    %230 = vector.extract_strided_slice %228 {offsets = [0, 32], sizes = [2, 32], strides = [1, 1]} : vector<2x64xf32> to vector<2x32xf32>
    %231 = tpu.concatenate %229, %230 in 1 : vector<2x32xf32>, vector<2x32xf32> -> vector<2x64xf32>
    %232 = vector.extract_strided_slice %120 {offsets = [0, 0], sizes = [2, 32], strides = [1, 1]} : vector<2x64xf32> to vector<2x32xf32>
    %233 = vector.extract_strided_slice %210 {offsets = [0, 32], sizes = [2, 32], strides = [1, 1]} : vector<2x64xf32> to vector<2x32xf32>
    %234 = tpu.concatenate %232, %233 in 1 : vector<2x32xf32>, vector<2x32xf32> -> vector<2x64xf32>
    %235 = vector.extract_strided_slice %138 {offsets = [0, 0], sizes = [2, 32], strides = [1, 1]} : vector<2x64xf32> to vector<2x32xf32>
    %236 = vector.extract_strided_slice %192 {offsets = [0, 32], sizes = [2, 32], strides = [1, 1]} : vector<2x64xf32> to vector<2x32xf32>
    %237 = tpu.concatenate %235, %236 in 1 : vector<2x32xf32>, vector<2x32xf32> -> vector<2x64xf32>
    %238 = vector.extract_strided_slice %156 {offsets = [0, 0], sizes = [2, 32], strides = [1, 1]} : vector<2x64xf32> to vector<2x32xf32>
    %239 = vector.extract_strided_slice %174 {offsets = [0, 32], sizes = [2, 32], strides = [1, 1]} : vector<2x64xf32> to vector<2x32xf32>
    %240 = tpu.concatenate %238, %239 in 1 : vector<2x32xf32>, vector<2x32xf32> -> vector<2x64xf32>
    %241 = vector.extract_strided_slice %174 {offsets = [0, 0], sizes = [2, 32], strides = [1, 1]} : vector<2x64xf32> to vector<2x32xf32>
    %242 = vector.extract_strided_slice %156 {offsets = [0, 32], sizes = [2, 32], strides = [1, 1]} : vector<2x64xf32> to vector<2x32xf32>
    %243 = tpu.concatenate %241, %242 in 1 : vector<2x32xf32>, vector<2x32xf32> -> vector<2x64xf32>
    %244 = vector.extract_strided_slice %192 {offsets = [0, 0], sizes = [2, 32], strides = [1, 1]} : vector<2x64xf32> to vector<2x32xf32>
    %245 = vector.extract_strided_slice %138 {offsets = [0, 32], sizes = [2, 32], strides = [1, 1]} : vector<2x64xf32> to vector<2x32xf32>
    %246 = tpu.concatenate %244, %245 in 1 : vector<2x32xf32>, vector<2x32xf32> -> vector<2x64xf32>
    %247 = vector.extract_strided_slice %210 {offsets = [0, 0], sizes = [2, 32], strides = [1, 1]} : vector<2x64xf32> to vector<2x32xf32>
    %248 = vector.extract_strided_slice %120 {offsets = [0, 32], sizes = [2, 32], strides = [1, 1]} : vector<2x64xf32> to vector<2x32xf32>
    %249 = tpu.concatenate %247, %248 in 1 : vector<2x32xf32>, vector<2x32xf32> -> vector<2x64xf32>
    %250 = vector.extract_strided_slice %228 {offsets = [0, 0], sizes = [2, 32], strides = [1, 1]} : vector<2x64xf32> to vector<2x32xf32>
    %251 = vector.extract_strided_slice %102 {offsets = [0, 32], sizes = [2, 32], strides = [1, 1]} : vector<2x64xf32> to vector<2x32xf32>
    %252 = tpu.concatenate %250, %251 in 1 : vector<2x32xf32>, vector<2x32xf32> -> vector<2x64xf32>
    %253 = tpu.concatenate %231, %234, %237, %240, %243, %246, %249, %252 in 0 : vector<2x64xf32>, vector<2x64xf32>, vector<2x64xf32>, vector<2x64xf32>, vector<2x64xf32>, vector<2x64xf32>, vector<2x64xf32>, vector<2x64xf32> -> vector<16x64xf32>
    %254 = arith.truncf %253 : vector<16x64xf32> to vector<16x64xbf16>
    %c0_28 = arith.constant 0 : index
    %c0_29 = arith.constant 0 : index
    %255 = vector.load %arg5[%c0_28, %c0_29] : memref<64x256xbf16, #tpu.memory_space<vmem>>, vector<64x256xbf16>
    %cst_30 = arith.constant dense<0.000000e+00> : vector<16x256xf32>
    %256 = tpu.matmul %254, %255, %cst_30 {dimension_numbers = #tpu.dot_dimension_numbers<[1], [0], [0], [1], [0, 0, 1, 1], [], []>} : vector<16x64xbf16>, vector<64x256xbf16>, vector<16x256xf32> -> vector<16x256xf32>
    %c0_31 = arith.constant 0 : index
    %c0_32 = arith.constant 0 : index
    %257 = vector.load %arg7[%c0_31, %c0_32] : memref<1x256xf32, #tpu.memory_space<vmem>>, vector<1x256xf32>
    %258 = vector.broadcast %257 : vector<1x256xf32> to vector<16x256xf32>
    %259 = arith.addf %256, %258 : vector<16x256xf32>
    %260 = vector.extract_strided_slice %259 {offsets = [0, 0], sizes = [2, 256], strides = [1, 1]} : vector<16x256xf32> to vector<2x256xf32>
    %261 = vector.extract_strided_slice %259 {offsets = [14, 0], sizes = [2, 256], strides = [1, 1]} : vector<16x256xf32> to vector<2x256xf32>
    %262 = arith.select %18, %260, %261 : vector<2x256xi1>, vector<2x256xf32>
    %263 = vector.extract_strided_slice %259 {offsets = [2, 0], sizes = [2, 256], strides = [1, 1]} : vector<16x256xf32> to vector<2x256xf32>
    %264 = vector.extract_strided_slice %259 {offsets = [12, 0], sizes = [2, 256], strides = [1, 1]} : vector<16x256xf32> to vector<2x256xf32>
    %265 = arith.select %18, %263, %264 : vector<2x256xi1>, vector<2x256xf32>
    %266 = vector.extract_strided_slice %259 {offsets = [4, 0], sizes = [2, 256], strides = [1, 1]} : vector<16x256xf32> to vector<2x256xf32>
    %267 = vector.extract_strided_slice %259 {offsets = [10, 0], sizes = [2, 256], strides = [1, 1]} : vector<16x256xf32> to vector<2x256xf32>
    %268 = arith.select %18, %266, %267 : vector<2x256xi1>, vector<2x256xf32>
    %269 = vector.extract_strided_slice %259 {offsets = [6, 0], sizes = [2, 256], strides = [1, 1]} : vector<16x256xf32> to vector<2x256xf32>
    %270 = vector.extract_strided_slice %259 {offsets = [8, 0], sizes = [2, 256], strides = [1, 1]} : vector<16x256xf32> to vector<2x256xf32>
    %271 = arith.select %18, %269, %270 : vector<2x256xi1>, vector<2x256xf32>
    %272 = vector.extract_strided_slice %259 {offsets = [8, 0], sizes = [2, 256], strides = [1, 1]} : vector<16x256xf32> to vector<2x256xf32>
    %273 = vector.extract_strided_slice %259 {offsets = [6, 0], sizes = [2, 256], strides = [1, 1]} : vector<16x256xf32> to vector<2x256xf32>
    %274 = arith.select %18, %272, %273 : vector<2x256xi1>, vector<2x256xf32>
    %275 = vector.extract_strided_slice %259 {offsets = [10, 0], sizes = [2, 256], strides = [1, 1]} : vector<16x256xf32> to vector<2x256xf32>
    %276 = vector.extract_strided_slice %259 {offsets = [4, 0], sizes = [2, 256], strides = [1, 1]} : vector<16x256xf32> to vector<2x256xf32>
    %277 = arith.select %18, %275, %276 : vector<2x256xi1>, vector<2x256xf32>
    %278 = vector.extract_strided_slice %259 {offsets = [12, 0], sizes = [2, 256], strides = [1, 1]} : vector<16x256xf32> to vector<2x256xf32>
    %279 = vector.extract_strided_slice %259 {offsets = [2, 0], sizes = [2, 256], strides = [1, 1]} : vector<16x256xf32> to vector<2x256xf32>
    %280 = arith.select %18, %278, %279 : vector<2x256xi1>, vector<2x256xf32>
    %281 = vector.extract_strided_slice %259 {offsets = [14, 0], sizes = [2, 256], strides = [1, 1]} : vector<16x256xf32> to vector<2x256xf32>
    %282 = vector.extract_strided_slice %259 {offsets = [0, 0], sizes = [2, 256], strides = [1, 1]} : vector<16x256xf32> to vector<2x256xf32>
    %283 = arith.select %18, %281, %282 : vector<2x256xi1>, vector<2x256xf32>
    %c0_33 = arith.constant 0 : index
    %c0_34 = arith.constant 0 : index
    %284 = vector.load %arg6[%c0_33, %c0_34] : memref<64x256xbf16, #tpu.memory_space<vmem>>, vector<64x256xbf16>
    %cst_35 = arith.constant 0.000000e+00 : f32
    %285 = vector.broadcast %cst_35 : f32 to vector<2x64xf32>
    %cst_36 = arith.constant 0.000000e+00 : f32
    %286 = vector.broadcast %cst_36 : f32 to vector<2x64xf32>
    %cst_37 = arith.constant 0.000000e+00 : f32
    %287 = vector.broadcast %cst_37 : f32 to vector<2x64xf32>
    %288 = arith.truncf %285 : vector<2x64xf32> to vector<2x64xbf16>
    %cst_38 = arith.constant dense<0.000000e+00> : vector<2x256xf32>
    %289 = tpu.matmul %288, %284, %cst_38 {dimension_numbers = #tpu.dot_dimension_numbers<[1], [0], [0], [1], [0, 0, 1, 1], [], []>} : vector<2x64xbf16>, vector<64x256xbf16>, vector<2x256xf32> -> vector<2x256xf32>
    %290 = arith.addf %262, %289 : vector<2x256xf32>
    %291 = arith.negf %290 : vector<2x256xf32>
    %292 = math.exp %291 : vector<2x256xf32>
    %cst_39 = arith.constant 1.000000e+00 : f32
    %293 = vector.broadcast %cst_39 : f32 to vector<2x256xf32>
    %294 = arith.addf %293, %292 : vector<2x256xf32>
    %295 = arith.divf %293, %294 : vector<2x256xf32>
    %296 = vector.extract_strided_slice %295 {offsets = [0, 0], sizes = [2, 64], strides = [1, 1]} : vector<2x256xf32> to vector<2x64xf32>
    %297 = vector.extract_strided_slice %295 {offsets = [0, 64], sizes = [2, 64], strides = [1, 1]} : vector<2x256xf32> to vector<2x64xf32>
    %298 = vector.extract_strided_slice %290 {offsets = [0, 128], sizes = [2, 64], strides = [1, 1]} : vector<2x256xf32> to vector<2x64xf32>
    %299 = math.tanh %298 : vector<2x64xf32>
    %300 = vector.extract_strided_slice %295 {offsets = [0, 192], sizes = [2, 64], strides = [1, 1]} : vector<2x256xf32> to vector<2x64xf32>
    %301 = arith.mulf %297, %286 : vector<2x64xf32>
    %302 = arith.mulf %296, %299 : vector<2x64xf32>
    %303 = arith.addf %301, %302 : vector<2x64xf32>
    %304 = math.tanh %303 : vector<2x64xf32>
    %305 = arith.mulf %300, %304 : vector<2x64xf32>
    %306 = arith.addf %287, %305 : vector<2x64xf32>
    %307 = arith.truncf %305 : vector<2x64xf32> to vector<2x64xbf16>
    %cst_40 = arith.constant dense<0.000000e+00> : vector<2x256xf32>
    %308 = tpu.matmul %307, %284, %cst_40 {dimension_numbers = #tpu.dot_dimension_numbers<[1], [0], [0], [1], [0, 0, 1, 1], [], []>} : vector<2x64xbf16>, vector<64x256xbf16>, vector<2x256xf32> -> vector<2x256xf32>
    %309 = arith.addf %265, %308 : vector<2x256xf32>
    %310 = arith.negf %309 : vector<2x256xf32>
    %311 = math.exp %310 : vector<2x256xf32>
    %cst_41 = arith.constant 1.000000e+00 : f32
    %312 = vector.broadcast %cst_41 : f32 to vector<2x256xf32>
    %313 = arith.addf %312, %311 : vector<2x256xf32>
    %314 = arith.divf %312, %313 : vector<2x256xf32>
    %315 = vector.extract_strided_slice %314 {offsets = [0, 0], sizes = [2, 64], strides = [1, 1]} : vector<2x256xf32> to vector<2x64xf32>
    %316 = vector.extract_strided_slice %314 {offsets = [0, 64], sizes = [2, 64], strides = [1, 1]} : vector<2x256xf32> to vector<2x64xf32>
    %317 = vector.extract_strided_slice %309 {offsets = [0, 128], sizes = [2, 64], strides = [1, 1]} : vector<2x256xf32> to vector<2x64xf32>
    %318 = math.tanh %317 : vector<2x64xf32>
    %319 = vector.extract_strided_slice %314 {offsets = [0, 192], sizes = [2, 64], strides = [1, 1]} : vector<2x256xf32> to vector<2x64xf32>
    %320 = arith.mulf %316, %303 : vector<2x64xf32>
    %321 = arith.mulf %315, %318 : vector<2x64xf32>
    %322 = arith.addf %320, %321 : vector<2x64xf32>
    %323 = math.tanh %322 : vector<2x64xf32>
    %324 = arith.mulf %319, %323 : vector<2x64xf32>
    %325 = arith.addf %306, %324 : vector<2x64xf32>
    %326 = arith.truncf %324 : vector<2x64xf32> to vector<2x64xbf16>
    %cst_42 = arith.constant dense<0.000000e+00> : vector<2x256xf32>
    %327 = tpu.matmul %326, %284, %cst_42 {dimension_numbers = #tpu.dot_dimension_numbers<[1], [0], [0], [1], [0, 0, 1, 1], [], []>} : vector<2x64xbf16>, vector<64x256xbf16>, vector<2x256xf32> -> vector<2x256xf32>
    %328 = arith.addf %268, %327 : vector<2x256xf32>
    %329 = arith.negf %328 : vector<2x256xf32>
    %330 = math.exp %329 : vector<2x256xf32>
    %cst_43 = arith.constant 1.000000e+00 : f32
    %331 = vector.broadcast %cst_43 : f32 to vector<2x256xf32>
    %332 = arith.addf %331, %330 : vector<2x256xf32>
    %333 = arith.divf %331, %332 : vector<2x256xf32>
    %334 = vector.extract_strided_slice %333 {offsets = [0, 0], sizes = [2, 64], strides = [1, 1]} : vector<2x256xf32> to vector<2x64xf32>
    %335 = vector.extract_strided_slice %333 {offsets = [0, 64], sizes = [2, 64], strides = [1, 1]} : vector<2x256xf32> to vector<2x64xf32>
    %336 = vector.extract_strided_slice %328 {offsets = [0, 128], sizes = [2, 64], strides = [1, 1]} : vector<2x256xf32> to vector<2x64xf32>
    %337 = math.tanh %336 : vector<2x64xf32>
    %338 = vector.extract_strided_slice %333 {offsets = [0, 192], sizes = [2, 64], strides = [1, 1]} : vector<2x256xf32> to vector<2x64xf32>
    %339 = arith.mulf %335, %322 : vector<2x64xf32>
    %340 = arith.mulf %334, %337 : vector<2x64xf32>
    %341 = arith.addf %339, %340 : vector<2x64xf32>
    %342 = math.tanh %341 : vector<2x64xf32>
    %343 = arith.mulf %338, %342 : vector<2x64xf32>
    %344 = arith.addf %325, %343 : vector<2x64xf32>
    %345 = arith.truncf %343 : vector<2x64xf32> to vector<2x64xbf16>
    %cst_44 = arith.constant dense<0.000000e+00> : vector<2x256xf32>
    %346 = tpu.matmul %345, %284, %cst_44 {dimension_numbers = #tpu.dot_dimension_numbers<[1], [0], [0], [1], [0, 0, 1, 1], [], []>} : vector<2x64xbf16>, vector<64x256xbf16>, vector<2x256xf32> -> vector<2x256xf32>
    %347 = arith.addf %271, %346 : vector<2x256xf32>
    %348 = arith.negf %347 : vector<2x256xf32>
    %349 = math.exp %348 : vector<2x256xf32>
    %cst_45 = arith.constant 1.000000e+00 : f32
    %350 = vector.broadcast %cst_45 : f32 to vector<2x256xf32>
    %351 = arith.addf %350, %349 : vector<2x256xf32>
    %352 = arith.divf %350, %351 : vector<2x256xf32>
    %353 = vector.extract_strided_slice %352 {offsets = [0, 0], sizes = [2, 64], strides = [1, 1]} : vector<2x256xf32> to vector<2x64xf32>
    %354 = vector.extract_strided_slice %352 {offsets = [0, 64], sizes = [2, 64], strides = [1, 1]} : vector<2x256xf32> to vector<2x64xf32>
    %355 = vector.extract_strided_slice %347 {offsets = [0, 128], sizes = [2, 64], strides = [1, 1]} : vector<2x256xf32> to vector<2x64xf32>
    %356 = math.tanh %355 : vector<2x64xf32>
    %357 = vector.extract_strided_slice %352 {offsets = [0, 192], sizes = [2, 64], strides = [1, 1]} : vector<2x256xf32> to vector<2x64xf32>
    %358 = arith.mulf %354, %341 : vector<2x64xf32>
    %359 = arith.mulf %353, %356 : vector<2x64xf32>
    %360 = arith.addf %358, %359 : vector<2x64xf32>
    %361 = math.tanh %360 : vector<2x64xf32>
    %362 = arith.mulf %357, %361 : vector<2x64xf32>
    %363 = arith.addf %344, %362 : vector<2x64xf32>
    %364 = arith.truncf %362 : vector<2x64xf32> to vector<2x64xbf16>
    %cst_46 = arith.constant dense<0.000000e+00> : vector<2x256xf32>
    %365 = tpu.matmul %364, %284, %cst_46 {dimension_numbers = #tpu.dot_dimension_numbers<[1], [0], [0], [1], [0, 0, 1, 1], [], []>} : vector<2x64xbf16>, vector<64x256xbf16>, vector<2x256xf32> -> vector<2x256xf32>
    %366 = arith.addf %274, %365 : vector<2x256xf32>
    %367 = arith.negf %366 : vector<2x256xf32>
    %368 = math.exp %367 : vector<2x256xf32>
    %cst_47 = arith.constant 1.000000e+00 : f32
    %369 = vector.broadcast %cst_47 : f32 to vector<2x256xf32>
    %370 = arith.addf %369, %368 : vector<2x256xf32>
    %371 = arith.divf %369, %370 : vector<2x256xf32>
    %372 = vector.extract_strided_slice %371 {offsets = [0, 0], sizes = [2, 64], strides = [1, 1]} : vector<2x256xf32> to vector<2x64xf32>
    %373 = vector.extract_strided_slice %371 {offsets = [0, 64], sizes = [2, 64], strides = [1, 1]} : vector<2x256xf32> to vector<2x64xf32>
    %374 = vector.extract_strided_slice %366 {offsets = [0, 128], sizes = [2, 64], strides = [1, 1]} : vector<2x256xf32> to vector<2x64xf32>
    %375 = math.tanh %374 : vector<2x64xf32>
    %376 = vector.extract_strided_slice %371 {offsets = [0, 192], sizes = [2, 64], strides = [1, 1]} : vector<2x256xf32> to vector<2x64xf32>
    %377 = arith.mulf %373, %360 : vector<2x64xf32>
    %378 = arith.mulf %372, %375 : vector<2x64xf32>
    %379 = arith.addf %377, %378 : vector<2x64xf32>
    %380 = math.tanh %379 : vector<2x64xf32>
    %381 = arith.mulf %376, %380 : vector<2x64xf32>
    %382 = arith.addf %363, %381 : vector<2x64xf32>
    %383 = arith.truncf %381 : vector<2x64xf32> to vector<2x64xbf16>
    %cst_48 = arith.constant dense<0.000000e+00> : vector<2x256xf32>
    %384 = tpu.matmul %383, %284, %cst_48 {dimension_numbers = #tpu.dot_dimension_numbers<[1], [0], [0], [1], [0, 0, 1, 1], [], []>} : vector<2x64xbf16>, vector<64x256xbf16>, vector<2x256xf32> -> vector<2x256xf32>
    %385 = arith.addf %277, %384 : vector<2x256xf32>
    %386 = arith.negf %385 : vector<2x256xf32>
    %387 = math.exp %386 : vector<2x256xf32>
    %cst_49 = arith.constant 1.000000e+00 : f32
    %388 = vector.broadcast %cst_49 : f32 to vector<2x256xf32>
    %389 = arith.addf %388, %387 : vector<2x256xf32>
    %390 = arith.divf %388, %389 : vector<2x256xf32>
    %391 = vector.extract_strided_slice %390 {offsets = [0, 0], sizes = [2, 64], strides = [1, 1]} : vector<2x256xf32> to vector<2x64xf32>
    %392 = vector.extract_strided_slice %390 {offsets = [0, 64], sizes = [2, 64], strides = [1, 1]} : vector<2x256xf32> to vector<2x64xf32>
    %393 = vector.extract_strided_slice %385 {offsets = [0, 128], sizes = [2, 64], strides = [1, 1]} : vector<2x256xf32> to vector<2x64xf32>
    %394 = math.tanh %393 : vector<2x64xf32>
    %395 = vector.extract_strided_slice %390 {offsets = [0, 192], sizes = [2, 64], strides = [1, 1]} : vector<2x256xf32> to vector<2x64xf32>
    %396 = arith.mulf %392, %379 : vector<2x64xf32>
    %397 = arith.mulf %391, %394 : vector<2x64xf32>
    %398 = arith.addf %396, %397 : vector<2x64xf32>
    %399 = math.tanh %398 : vector<2x64xf32>
    %400 = arith.mulf %395, %399 : vector<2x64xf32>
    %401 = arith.addf %382, %400 : vector<2x64xf32>
    %402 = arith.truncf %400 : vector<2x64xf32> to vector<2x64xbf16>
    %cst_50 = arith.constant dense<0.000000e+00> : vector<2x256xf32>
    %403 = tpu.matmul %402, %284, %cst_50 {dimension_numbers = #tpu.dot_dimension_numbers<[1], [0], [0], [1], [0, 0, 1, 1], [], []>} : vector<2x64xbf16>, vector<64x256xbf16>, vector<2x256xf32> -> vector<2x256xf32>
    %404 = arith.addf %280, %403 : vector<2x256xf32>
    %405 = arith.negf %404 : vector<2x256xf32>
    %406 = math.exp %405 : vector<2x256xf32>
    %cst_51 = arith.constant 1.000000e+00 : f32
    %407 = vector.broadcast %cst_51 : f32 to vector<2x256xf32>
    %408 = arith.addf %407, %406 : vector<2x256xf32>
    %409 = arith.divf %407, %408 : vector<2x256xf32>
    %410 = vector.extract_strided_slice %409 {offsets = [0, 0], sizes = [2, 64], strides = [1, 1]} : vector<2x256xf32> to vector<2x64xf32>
    %411 = vector.extract_strided_slice %409 {offsets = [0, 64], sizes = [2, 64], strides = [1, 1]} : vector<2x256xf32> to vector<2x64xf32>
    %412 = vector.extract_strided_slice %404 {offsets = [0, 128], sizes = [2, 64], strides = [1, 1]} : vector<2x256xf32> to vector<2x64xf32>
    %413 = math.tanh %412 : vector<2x64xf32>
    %414 = vector.extract_strided_slice %409 {offsets = [0, 192], sizes = [2, 64], strides = [1, 1]} : vector<2x256xf32> to vector<2x64xf32>
    %415 = arith.mulf %411, %398 : vector<2x64xf32>
    %416 = arith.mulf %410, %413 : vector<2x64xf32>
    %417 = arith.addf %415, %416 : vector<2x64xf32>
    %418 = math.tanh %417 : vector<2x64xf32>
    %419 = arith.mulf %414, %418 : vector<2x64xf32>
    %420 = arith.addf %401, %419 : vector<2x64xf32>
    %421 = arith.truncf %419 : vector<2x64xf32> to vector<2x64xbf16>
    %cst_52 = arith.constant dense<0.000000e+00> : vector<2x256xf32>
    %422 = tpu.matmul %421, %284, %cst_52 {dimension_numbers = #tpu.dot_dimension_numbers<[1], [0], [0], [1], [0, 0, 1, 1], [], []>} : vector<2x64xbf16>, vector<64x256xbf16>, vector<2x256xf32> -> vector<2x256xf32>
    %423 = arith.addf %283, %422 : vector<2x256xf32>
    %424 = arith.negf %423 : vector<2x256xf32>
    %425 = math.exp %424 : vector<2x256xf32>
    %cst_53 = arith.constant 1.000000e+00 : f32
    %426 = vector.broadcast %cst_53 : f32 to vector<2x256xf32>
    %427 = arith.addf %426, %425 : vector<2x256xf32>
    %428 = arith.divf %426, %427 : vector<2x256xf32>
    %429 = vector.extract_strided_slice %428 {offsets = [0, 0], sizes = [2, 64], strides = [1, 1]} : vector<2x256xf32> to vector<2x64xf32>
    %430 = vector.extract_strided_slice %428 {offsets = [0, 64], sizes = [2, 64], strides = [1, 1]} : vector<2x256xf32> to vector<2x64xf32>
    %431 = vector.extract_strided_slice %423 {offsets = [0, 128], sizes = [2, 64], strides = [1, 1]} : vector<2x256xf32> to vector<2x64xf32>
    %432 = math.tanh %431 : vector<2x64xf32>
    %433 = vector.extract_strided_slice %428 {offsets = [0, 192], sizes = [2, 64], strides = [1, 1]} : vector<2x256xf32> to vector<2x64xf32>
    %434 = arith.mulf %430, %417 : vector<2x64xf32>
    %435 = arith.mulf %429, %432 : vector<2x64xf32>
    %436 = arith.addf %434, %435 : vector<2x64xf32>
    %437 = math.tanh %436 : vector<2x64xf32>
    %438 = arith.mulf %433, %437 : vector<2x64xf32>
    %439 = arith.addf %420, %438 : vector<2x64xf32>
    %cst_54 = arith.constant 1.250000e-01 : f32
    %440 = vector.broadcast %cst_54 : f32 to vector<2x64xf32>
    %441 = arith.mulf %439, %440 : vector<2x64xf32>
    %c0_55 = arith.constant 0 : index
    %c0_56 = arith.constant 0 : index
    %442 = vector.load %arg8[%c0_55, %c0_56] : memref<1x64xf32, #tpu.memory_space<vmem>>, vector<1x64xf32>
    %443 = vector.broadcast %442 : vector<1x64xf32> to vector<2x64xf32>
    %444 = arith.mulf %441, %443 : vector<2x64xf32>
    %cst_57 = arith.constant dense<0.000000e+00> : vector<2xf32>
    %445 = vector.multi_reduction <add>, %444, %cst_57 [1] : vector<2x64xf32> to vector<2xf32>
    %446 = vector.shape_cast %445 : vector<2xf32> to vector<2x1xf32>
    %c0_58 = arith.constant 0 : index
    %c0_59 = arith.constant 0 : index
    %447 = vector.load %arg9[%c0_58, %c0_59] : memref<1x1xf32, #tpu.memory_space<vmem>>, vector<1x1xf32>
    %448 = vector.broadcast %447 : vector<1x1xf32> to vector<2x1xf32>
    %449 = arith.addf %446, %448 : vector<2x1xf32>
    %c0_60 = arith.constant 0 : index
    %c0_61 = arith.constant 0 : index
    %450 = vector.load %arg10[%c0_60, %c0_61] : memref<2x1xf32, #tpu.memory_space<vmem>>, vector<2x1xf32>
    tpu.vector_store %arg10[%c0_60, %c0_61], %449 {strides = array<i32>} : memref<2x1xf32, #tpu.memory_space<vmem>>, vector<2x1xf32>,
    return
  }
  func.func @transform_0(%arg0: i32) -> (i32, i32) {
    %c0_i32 = arith.constant 0 : i32
    %c0_i32_0 = arith.constant 0 : i32
    %c0_i32_1 = arith.constant 0 : i32
    return %c0_i32, %c0_i32_0 : i32, i32
  }
  func.func @transform_1(%arg0: i32) -> (i32, i32) {
    %c0_i32 = arith.constant 0 : i32
    %c0_i32_0 = arith.constant 0 : i32
    %c0_i32_1 = arith.constant 0 : i32
    return %c0_i32, %c0_i32_0 : i32, i32
  }
  func.func @transform_2(%arg0: i32) -> (i32, i32) {
    %c0_i32 = arith.constant 0 : i32
    %c0_i32_0 = arith.constant 0 : i32
    %c0_i32_1 = arith.constant 0 : i32
    return %c0_i32, %c0_i32_0 : i32, i32
  }
  func.func @transform_3(%arg0: i32) -> (i32, i32) {
    %c0_i32 = arith.constant 0 : i32
    %c0_i32_0 = arith.constant 0 : i32
    %c0_i32_1 = arith.constant 0 : i32
    return %c0_i32, %c0_i32_0 : i32, i32
  }
  func.func @transform_4(%arg0: i32) -> (i32, i32) {
    %c0_i32 = arith.constant 0 : i32
    %c0_i32_0 = arith.constant 0 : i32
    %c0_i32_1 = arith.constant 0 : i32
    return %c0_i32, %c0_i32_0 : i32, i32
  }
  func.func @transform_5(%arg0: i32) -> (i32, i32) {
    %c0_i32 = arith.constant 0 : i32
    %c0_i32_0 = arith.constant 0 : i32
    %c0_i32_1 = arith.constant 0 : i32
    return %c0_i32, %c0_i32_0 : i32, i32
  }
  func.func @transform_6(%arg0: i32) -> (i32, i32) {
    %c0_i32 = arith.constant 0 : i32
    %c0_i32_0 = arith.constant 0 : i32
    %c0_i32_1 = arith.constant 0 : i32
    return %c0_i32, %c0_i32_0 : i32, i32
  }
  func.func @transform_7(%arg0: i32) -> (i32, i32) {
    %c0_i32 = arith.constant 0 : i32
    %c0_i32_0 = arith.constant 0 : i32
    %c0_i32_1 = arith.constant 0 : i32
    return %c0_i32, %c0_i32_0 : i32, i32
  }
  func.func @transform_8(%arg0: i32) -> (i32, i32) {
    %c0_i32 = arith.constant 0 : i32
    %c0_i32_0 = arith.constant 0 : i32
    %c0_i32_1 = arith.constant 0 : i32
    return %c0_i32, %c0_i32_0 : i32, i32
  }
  func.func @transform_9(%arg0: i32) -> (i32, i32) {
    %c0_i32 = arith.constant 0 : i32
    %c0_i32_0 = arith.constant 0 : i32
    %c0_i32_1 = arith.constant 0 : i32
    return %c0_i32, %c0_i32_0 : i32, i32
  }
}

</mosaic_0001>

<bundles_post_ra>
// kernel: mynet_forward.1
= control target key start
LH: loop header
LB: loop body
LE: loop exit
PB: predicated region body
PF: predicated region fallthrough
CT: control target
= control target key end

     0   :  { %vm93_vm0 = vcmask 1041408   ;;  %v2123_v1 = vmov 0   ;;  %vm89_vm1 = vcmask 31744   ;;  %v35_v15 = vlaneseq  ;;  %s2814_s1 = inlined_call_operand.vmem [shape: bf16[4,256], index: 1, kind: input, shape index: {}]   ;;  %s2815_s2 = inlined_call_operand.vmem [shape: bf16[64,256], index: 2, kind: input, shape index: {}]   ;;  %s2816_s0 = inlined_call_operand.vmem [shape: f32[16,4], index: 0, kind: input, shape index: {}]   ;;  %s2817_s3 = inlined_call_operand.vmem [shape: f32[1,256], index: 3, kind: input, shape index: {}]   ;;  %s2818_s4 = inlined_call_operand.vmem [shape: bf16[64,256], index: 4, kind: input, shape index: {}]   ;;  %s2819_s5 = inlined_call_operand.vmem [shape: bf16[64,256], index: 5, kind: input, shape index: {}]   ;;  %s2820_s6 = inlined_call_operand.vmem [shape: f32[1,256], index: 6, kind: input, shape index: {}]   ;;  %s2821_s7 = inlined_call_operand.vmem [shape: f32[1,64], index: 7, kind: input, shape index: {}]   ;;  %s2822_s8 = inlined_call_operand.<no memory space> [shape: f32[1,1], index: 8, kind: input, shape index: {}]   ;;  %s2823_s9 = inlined_call_operand.vmem [shape: f32[2,1], index: 9, kind: output, shape index: {}]  }
   0x1   :  { %v1797_v0 = vld.sshfl [vmem:[%s2814_s1] sm:$0x33 pattern:$0x76325410]  ;;  %132 = vmatprep.mubr.bf16.mxu0 %v2123_v1  ;;  %320 = vmatprep.mubr.bf16.mxu1 %v2123_v1  ;;  %v2183_v3 = vld [vmem:[%s2815_s2 + $0x4] ss:$8 sps:$4 sm:$0xff]  }
   0x2   :  { %v88_v2 = vcombine.high %v1797_v0, %v1797_v0  ;;  %v95_v4 = vsel %vm93_vm0, %v1797_v0, 0  ;;  %v2189_v5 = vld [vmem:[%s2815_s2] ss:$8 sps:$4 sm:$0xff]   ;;  %288 = vmatprep.subr.bf16.mxu1 %v2183_v3  ;;  %v2202_v9 = vld [vmem:[%s2815_s2 + $0x14] ss:$8 sps:$4 sm:$0xff]   ;;  %v2257_v16 = vshrl.u32 %v35_v15, 7 }
   0x3   :  { %v64_v6 = vld [vmem:[%s2816_s0] sm:$0xff]  ;;  %v65_v7 = vld [vmem:[%s2816_s0 + $0x8] sm:$0xff]  ;;  %289 = vmatpush1.bf16.msra.mxu1 %v2189_v5  ;;  %v2208_v10 = vld [vmem:[%s2815_s2 + $0x10] ss:$8 sps:$4 sm:$0xff]   ;;  %v36_v17 = vand.u32 127, %v35_v15  ;;  %vm149_vm4 = vcmask 1040384  }
   0x4   :  { %1798 = vmatprep.subr.msk.bf16.mxu0 %vm93_vm0, %v88_v2  ;;  %v66_v8 = vpack.c.bf16 %v65_v7, %v64_v6  ;;  %290 = vmatprep.subr.bf16.mxu1 %v2202_v9  ;;  %v2214_v11 = vld [vmem:[%s2815_s2 + $0x24] ss:$8 sps:$4 sm:$0xff]   ;;  %v2221_v12 = vld [vmem:[%s2815_s2 + $0x20] ss:$8 sps:$4 sm:$0xff]   ;;  %v2228_v13 = vld [vmem:[%s2815_s2 + $0x34] ss:$8 sps:$4 sm:$0xff]  }
   0x5   :  { %101 = vmatpush1.bf16.msra.mxu0 %v95_v4  ;;  %v2236_v14 = vld [vmem:[%s2815_s2 + $0x30] ss:$8 sps:$4 sm:$0xff]   ;;  %v72_v18 = vsub.s32 0, %v2257_v16  ;;  %v37_v19 = vadd.s32 128, %v36_v17  ;;  %v68_v20 = vld [vmem:[%s2817_s3] sm:$0x3] }
   0x6   :  { %360 = vmatprep.subr.bf16.mxu0 %v2183_v3  ;;  %v76_v21 = vsub.s32 1, %v2257_v16  ;;  %v42_v23 = vand.u32 63, %v36_v17  ;;  %s2124_s3 = smov 64   ;;  %vm284_vm5 = vcmask 523264   ;;  %vm865_vm6 = vcmask 261120  }
   0x7   :  { %291 = vmatpush1.bf16.msra.mxu1 %v2208_v10  ;;  %v73_v22 = vrot.slane %v68_v20, %v72_v18  ;;  %v49_v24 = vand.u32 63, %v37_v19  ;;  %vm917_vm7 = vcmask 1043456   ;;  %vm919_vm8 = vcmask 1045504  }
   0x8   :  { %1799 = vmatmul.mubr.msk.bf16.vlgmr.msra.gmra.mrb[0].mxu0 %vm89_vm1, %v66_v8  ;;  %292 = vmatprep.subr.bf16.mxu1 %v2214_v11  ;;  %v77_v25 = vrot.slane %v68_v20, %v76_v21  ;;  %vm2270_vm2 = vcmp.lt.s32.totalorder %v42_v23, 32  ;;  %vm1779_vm9 = vcmask 517120   ;;  %vm1791_vm10 = vcmask 1024  }
   0x9   :  { %361 = vmatpush1.bf16.msra.mxu0 %v2189_v5  ;;  %392 = vmatprep.mubr.bf16.mxu0 %v2123_v1  ;;  %vm2274_vm3 = vcmp.lt.s32.totalorder %v49_v24, 32 }
   0xa   :  { %362 = vmatprep.subr.bf16.mxu0 %v2202_v9 }
   0xb   :  { %293 = vmatpush1.bf16.msra.mxu1 %v2221_v12 }
   0xc   :  { %294 = vmatprep.subr.bf16.mxu1 %v2228_v13 }
   0xd   :  { %363 = vmatpush1.bf16.msra.mxu0 %v2208_v10 }
   0xe   :  { %364 = vmatprep.subr.bf16.mxu0 %v2214_v11 }
   0xf   :  { %295 = vmatpush1.bf16.msra.mxu1 %v2236_v14 }
  0x10   :  { %432 = vmatprep.subr.bf16.mxu1 %v2183_v3 }
  0x11   :  { %365 = vmatpush1.bf16.msra.mxu0 %v2221_v12 }
  0x12   :  { %366 = vmatprep.subr.bf16.mxu0 %v2228_v13  ;;  %321 = vmatmul.mubr.bf16.vlgmr.msra.gmra.mrb[0].mxu1 %v2123_v1 }
  0x13   :  { %433 = vmatpush1.bf16.msra.mxu1 %v2189_v5  ;;  %464 = vmatprep.mubr.bf16.mxu1 %v2123_v1 }
  0x14   :  { %434 = vmatprep.subr.bf16.mxu1 %v2202_v9 }
  0x15   :  { %367 = vmatpush1.bf16.msra.mxu0 %v2236_v14 }
  0x16   :  { %504 = vmatprep.subr.bf16.mxu0 %v2183_v3 }
  0x17   :  { %435 = vmatpush1.bf16.msra.mxu1 %v2208_v10 }
  0x18   :  { %436 = vmatprep.subr.bf16.mxu1 %v2214_v11 }
  0x1b   :  { %437 = vmatpush1.bf16.msra.mxu1 %v2221_v12 }
  0x1c   :  { %438 = vmatprep.subr.bf16.mxu1 %v2228_v13 }
  0x1f   :  { %439 = vmatpush1.bf16.msra.mxu1 %v2236_v14 }
  0x20   :  { %576 = vmatprep.subr.bf16.mxu1 %v2183_v3 }
  0xdb   :  { %v134_v26 = vpop.f32.mrb[0].mxu0 }
  0xdc   :  { %v2268_v27 = vadd.f32 %v134_v26, %v73_v22  ;;  %v136_v28 = vpop.f32.mrb[1].mxu0 }
  0xdd   :  { %v2278_v31 = vadd.f32 %v136_v28, %v77_v25  ;;  %v138_v32 = vpop.f32.mrb[2].mxu0 }
  0xde   :  { %v139_v33 = vadd.f32 %v138_v32, %v73_v22  ;;  %v140_v34 = vpop.f32.mrb[3].mxu0  ;;  %v154_v35 = vrot.slane %v2268_v27, 7  ;;  %v166_v36 = vrot.slane %v2268_v27, 1  ;;  %v172_v37 = vrot.slane %v2268_v27, 6 }
  0xdf   :  { %v141_v38 = vadd.f32 %v140_v34, %v77_v25  ;;  %v155_v39 = vrot.slane %v2278_v31, 7  ;;  %v167_v40 = vrot.slane %v2278_v31, 1  ;;  %v173_v41 = vrot.slane %v2278_v31, 6 }
  0xe0   :  { %v145_v42 = vrot.slane %v139_v33, 7  ;;  %v158_v43 = vrot.slane %v139_v33, 6  ;;  %v2287_v44 = vsel %vm149_vm4, %v166_v36, %v139_v33  ;;  %v176_v45 = vrot.slane %v139_v33, 5 }
  0xe1   :  { %v146_v46 = vrot.slane %v141_v38, 7  ;;  %v159_v47 = vrot.slane %v141_v38, 6  ;;  %v2290_v48 = vsel %vm149_vm4, %v167_v40, %v141_v38  ;;  %v177_v49 = vrot.slane %v141_v38, 5 }
  0xe2   :  { %v2294_v50 = vsel %vm149_vm4, %v2268_v27, %v145_v42  ;;  %v2297_v51 = vsel %vm149_vm4, %v154_v35, %v158_v43  ;;  %v2300_v52 = vsel %vm149_vm4, %v172_v37, %v176_v45  ;;  %v184_v53 = vrot.slane %v2268_v27, 2 }
  0xe3   :  { %v164_v54 = vsel %vm2270_vm2, %v2294_v50, %v2297_v51  ;;  %v2309_v55 = vsel %vm149_vm4, %v2278_v31, %v146_v46  ;;  %v2312_v56 = vsel %vm149_vm4, %v155_v39, %v159_v47  ;;  %v182_v57 = vsel %vm2270_vm2, %v2287_v44, %v2300_v52 }
  0xe4   :  { %v165_v58 = vsel %vm2274_vm3, %v2309_v55, %v2312_v56  ;;  %v2323_v59 = vsel %vm149_vm4, %v173_v41, %v177_v49  ;;  %v188_v60 = vrot.slane %v139_v33, 1  ;;  %v194_v61 = vrot.slane %v2268_v27, 5 }
  0xe5   :  { %v183_v62 = vsel %vm2274_vm3, %v2290_v48, %v2323_v59  ;;  %v198_v63 = vrot.slane %v139_v33, 4  ;;  %v185_v0 = vrot.slane %v2278_v31, 2  ;;  %v189_v2 = vrot.slane %v141_v38, 1  ;;  %v322_v15 = vpop.f32.mrb[0].mxu1 }
  0xe6   :  { %v2332_v4 = vsel %vm149_vm4, %v184_v53, %v188_v60  ;;  %v195_v6 = vrot.slane %v2278_v31, 5  ;;  %v199_v7 = vrot.slane %v141_v38, 4  ;;  %v206_v8 = vrot.slane %v2268_v27, 3  ;;  %v324_v24 = vpop.f32.mrb[1].mxu1 }
  0xe7   :  { %v2337_v17 = vsel %vm149_vm4, %v194_v61, %v198_v63  ;;  %v2340_v19 = vsel %vm149_vm4, %v185_v0, %v189_v2  ;;  %v210_v20 = vrot.slane %v139_v33, 2  ;;  %v216_v22 = vrot.slane %v2268_v27, 4  ;;  %v326_v34 = vpop.f32.mrb[2].mxu1 }
  0xe8   :  { %v329_v23 = vadd.f32 %v322_v15, %v164_v54  ;;  %v204_v25 = vsel %vm2270_vm2, %v2332_v4, %v2337_v17  ;;  %v2348_v26 = vsel %vm149_vm4, %v195_v6, %v199_v7  ;;  %v220_v28 = vrot.slane %v139_v33, 3  ;;  %v327_v39 = vpop.f32.mrb[3].mxu1 }
  0xe9   :  { %v330_v32 = vadd.f32 %v324_v24, %v165_v58  ;;  %v205_v35 = vsel %vm2274_vm3, %v2340_v19, %v2348_v26  ;;  %v2355_v27 = vsel %vm149_vm4, %v206_v8, %v210_v20  ;;  %v207_v36 = vrot.slane %v2278_v31, 3 }
  0xea   :  { %v1808_v37 = vmul.f32 -1.442695, %v329_v23  ;;  %v2359_v40 = vsel %vm149_vm4, %v216_v22, %v220_v28  ;;  %v211_v41 = vrot.slane %v141_v38, 2  ;;  %v217_v33 = vrot.slane %v2278_v31, 4 }
  0xeb   :  { %v226_v42 = vsel %vm2270_vm2, %v2355_v27, %v2359_v40  ;;  %v221_v43 = vrot.slane %v141_v38, 3  ;;  %v228_v46 = vsel %vm2270_vm2, %v2359_v40, %v2355_v27  ;;  %v230_v31 = vsel %vm2270_vm2, %v2337_v17, %v2332_v4 }
  0xec   :  { %1931 = vpow2.f32 %v1808_v37  ;;  %v2367_v45 = vsel %vm149_vm4, %v207_v36, %v211_v41  ;;  %v231_v38 = vsel %vm2274_vm3, %v2348_v26, %v2340_v19  ;;  %v232_v49 = vsel %vm2270_vm2, %v2300_v52, %v2287_v44 }
  0xed   :  { %v2378_v47 = vsel %vm149_vm4, %v217_v33, %v221_v43  ;;  %v233_v58 = vsel %vm2274_vm3, %v2323_v59, %v2290_v48  ;;  %v234_v60 = vsel %vm2270_vm2, %v2297_v51, %v2294_v50  ;;  %v235_v61 = vsel %vm2274_vm3, %v2312_v56, %v2309_v55  ;;  %v1907_v51 = vld [vmem:[%s2818_s4] ss:$8 sps:$4 sm:$0xff]   ;;  %v1909_v56 = vld [vmem:[%s2818_s4 + $0x4] ss:$8 sps:$4 sm:$0xff]  }
  0xee   :  { %v227_v53 = vsel %vm2274_vm3, %v2367_v45, %v2378_v47  ;;  %v229_v54 = vsel %vm2274_vm3, %v2378_v47, %v2367_v45  ;;  %1933 = vtanh.f32 %v330_v32  ;;  %v1809_v8 = vmul.f32 -1.442695, %v330_v32 }
  0xf6   :  { %v1932_v63 = vpop.eup %1931 }
  0xf7   :  { %v337_v0 = vadd.f32 1.0, %v1932_v63 }
  0xf8   :  { %v1934_v2 = vpop.eup %1933 }
  0xf9   :  { %1935 = vrcp.f32 %v337_v0 }
  0xfa   :  { %1937 = vpow2.f32 %v1809_v8 }
 0x103   :  { %v1936_v6 = vpop.eup %1935 }
 0x104   :  { %v345_v7 = vmul.f32 %v1936_v6, %v1934_v2  ;;  %v1938_v15 = vpop.eup %1937  ;;  %v344_v22 = vmul.f32 0.0, %v1936_v6 }
 0x105   :  { %v338_v20 = vadd.f32 1.0, %v1938_v15 }
 0x106   :  { %347 = vrot.lane.b32.xlu0 %v345_v7, %s2124_s3 }
 0x107   :  { %1939 = vrcp.f32 %v338_v20 }
 0x111   :  { %v1940_v28 = vpop.eup %1939 }
 0x178   :  { %v348_v23 = vpop.permute.xlu0 %347 }
 0x179   :  { %v350_v24 = vadd.f32 %v348_v23, %v344_v22 }
 0x17b   :  { %1941 = vtanh.f32 %v350_v24 }
 0x185   :  { %v1942_v34 = vpop.eup %1941 }
 0x186   :  { %v2409_v36 = vmul.f32 %v1942_v34, %v1940_v28 }
 0x188   :  { %v353_v37 = vpack.c.bf16 %v2409_v36, %v2409_v36 }
 0x18a   :  { %355 = vrot.lane.b32.xlu0 %v353_v37, %s2124_s3 }
 0x1fc   :  { %v356_v39 = vpop.permute.xlu0 %355 }
 0x1fd   :  { %1810 = vmatmul.mubr.msk.bf16.vlgmr.msra.gmra.mrb[4].mxu0 %vm284_vm5, %v356_v39 }
 0x1fe   :  { %505 = vmatpush1.bf16.msra.mxu0 %v2189_v5  ;;  %536 = vmatprep.mubr.bf16.mxu0 %v2123_v1 }
 0x1ff   :  { %506 = vmatprep.subr.bf16.mxu0 %v2202_v9 }
 0x202   :  { %507 = vmatpush1.bf16.msra.mxu0 %v2208_v10 }
 0x203   :  { %508 = vmatprep.subr.bf16.mxu0 %v2214_v11 }
 0x206   :  { %509 = vmatpush1.bf16.msra.mxu0 %v2221_v12 }
 0x207   :  { %510 = vmatprep.subr.bf16.mxu0 %v2228_v13 }
 0x20a   :  { %511 = vmatpush1.bf16.msra.mxu0 %v2236_v14 }
 0x20b   :  { %648 = vmatprep.subr.bf16.mxu0 %v2183_v3 }
 0x2d0   :  { %v394_v32 = vpop.f32.mrb[4].mxu0 }
 0x2d1   :  { %v401_v41 = vadd.f32 %v394_v32, %v182_v57  ;;  %v396_v33 = vpop.f32.mrb[5].mxu0 }
 0x2d2   :  { %v402_v43 = vadd.f32 %v396_v33, %v183_v62  ;;  %v398_v63 = vpop.f32.mrb[6].mxu0 }
 0x2d3   :  { %v1811_v0 = vmul.f32 -1.442695, %v401_v41  ;;  %v399_v2 = vpop.f32.mrb[7].mxu0 }
 0x2d4   :  { %v1812_v57 = vmul.f32 -1.442695, %v402_v43 }
 0x2d5   :  { %1943 = vpow2.f32 %v1811_v0 }
 0x2d6   :  { %1945 = vtanh.f32 %v402_v43 }
 0x2df   :  { %v1944_v6 = vpop.eup %1943 }
 0x2e0   :  { %v409_v7 = vadd.f32 1.0, %v1944_v6  ;;  %v1946_v8 = vpop.eup %1945 }
 0x2e2   :  { %1947 = vrcp.f32 %v409_v7 }
 0x2e3   :  { %1949 = vpow2.f32 %v1812_v57 }
 0x2ec   :  { %v1948_v15 = vpop.eup %1947 }
 0x2ed   :  { %v417_v20 = vmul.f32 %v1948_v15, %v1946_v8  ;;  %v1950_v22 = vpop.eup %1949  ;;  %v416_v28 = vmul.f32 %v1948_v15, %v350_v24 }
 0x2ee   :  { %v410_v23 = vadd.f32 1.0, %v1950_v22 }
 0x2ef   :  { %419 = vrot.lane.b32.xlu1 %v417_v20, %s2124_s3 }
 0x2f0   :  { %1951 = vrcp.f32 %v410_v23 }
 0x2fa   :  { %v1952_v37 = vpop.eup %1951 }
 0x361   :  { %v420_v34 = vpop.permute.xlu1 %419 }
 0x362   :  { %v422_v62 = vadd.f32 %v420_v34, %v416_v28 }
 0x364   :  { %1953 = vtanh.f32 %v422_v62 }
 0x36e   :  { %v1954_v39 = vpop.eup %1953 }
 0x36f   :  { %v2435_v32 = vmul.f32 %v1954_v39, %v1952_v37 }
 0x371   :  { %v425_v41 = vpack.c.bf16 %v2435_v32, %v2435_v32 }
 0x373   :  { %427 = vrot.lane.b32.xlu1 %v425_v41, %s2124_s3 }
 0x3e5   :  { %v428_v33 = vpop.permute.xlu1 %427 }
 0x3e6   :  { %1813 = vmatmul.mubr.msk.bf16.vlgmr.msra.gmra.mrb[4].mxu1 %vm284_vm5, %v428_v33 }
 0x3e7   :  { %577 = vmatpush1.bf16.msra.mxu1 %v2189_v5  ;;  %608 = vmatprep.mubr.bf16.mxu1 %v2123_v1 }
 0x3e8   :  { %578 = vmatprep.subr.bf16.mxu1 %v2202_v9 }
 0x3eb   :  { %579 = vmatpush1.bf16.msra.mxu1 %v2208_v10 }
 0x3ec   :  { %580 = vmatprep.subr.bf16.mxu1 %v2214_v11 }
 0x3ef   :  { %581 = vmatpush1.bf16.msra.mxu1 %v2221_v12 }
 0x3f0   :  { %582 = vmatprep.subr.bf16.mxu1 %v2228_v13 }
 0x3f3   :  { %583 = vmatpush1.bf16.msra.mxu1 %v2236_v14 }
 0x3f4   :  { %720 = vmatprep.subr.bf16.mxu1 %v2183_v3 }
 0x4b9   :  { %v466_v24 = vpop.f32.mrb[4].mxu1 }
 0x4ba   :  { %v473_v43 = vadd.f32 %v466_v24, %v204_v25  ;;  %v468_v63 = vpop.f32.mrb[5].mxu1 }
 0x4bb   :  { %v474_v0 = vadd.f32 %v468_v63, %v205_v35  ;;  %v470_v2 = vpop.f32.mrb[6].mxu1 }
 0x4bc   :  { %v1814_v6 = vmul.f32 -1.442695, %v473_v43  ;;  %v471_v7 = vpop.f32.mrb[7].mxu1 }
 0x4bd   :  { %v1815_v25 = vmul.f32 -1.442695, %v474_v0 }
 0x4be   :  { %1955 = vpow2.f32 %v1814_v6 }
 0x4bf   :  { %1957 = vtanh.f32 %v474_v0 }
 0x4c8   :  { %v1956_v8 = vpop.eup %1955 }
 0x4c9   :  { %v481_v15 = vadd.f32 1.0, %v1956_v8  ;;  %v1958_v20 = vpop.eup %1957 }
 0x4cb   :  { %1959 = vrcp.f32 %v481_v15 }
 0x4cc   :  { %1961 = vpow2.f32 %v1815_v25 }
 0x4d5   :  { %v1960_v57 = vpop.eup %1959 }
 0x4d6   :  { %v489_v22 = vmul.f32 %v1960_v57, %v1958_v20  ;;  %v1962_v23 = vpop.eup %1961  ;;  %v488_v34 = vmul.f32 %v1960_v57, %v422_v62 }
 0x4d7   :  { %v482_v28 = vadd.f32 1.0, %v1962_v23 }
 0x4d8   :  { %491 = vrot.lane.b32.xlu0 %v489_v22, %s2124_s3 }
 0x4d9   :  { %1963 = vrcp.f32 %v482_v28 }
 0x4e3   :  { %v1964_v39 = vpop.eup %1963 }
 0x54a   :  { %v492_v37 = vpop.permute.xlu0 %491 }
 0x54b   :  { %v494_v35 = vadd.f32 %v492_v37, %v488_v34 }
 0x54d   :  { %1965 = vtanh.f32 %v494_v35 }
 0x557   :  { %v1966_v41 = vpop.eup %1965 }
 0x558   :  { %v2461_v33 = vmul.f32 %v1966_v41, %v1964_v39 }
 0x55a   :  { %v497_v24 = vpack.c.bf16 %v2461_v33, %v2461_v33 }
 0x55c   :  { %499 = vrot.lane.b32.xlu1 %v497_v24, %s2124_s3 }
 0x5ce   :  { %v500_v43 = vpop.permute.xlu1 %499 }
 0x5cf   :  { %1816 = vmatmul.mubr.msk.bf16.vlgmr.msra.gmra.mrb[8].mxu0 %vm284_vm5, %v500_v43 }
 0x5d0   :  { %649 = vmatpush1.bf16.msra.mxu0 %v2189_v5  ;;  %680 = vmatprep.mubr.bf16.mxu0 %v2123_v1 }
 0x5d1   :  { %650 = vmatprep.subr.bf16.mxu0 %v2202_v9 }
 0x5d4   :  { %651 = vmatpush1.bf16.msra.mxu0 %v2208_v10 }
 0x5d5   :  { %652 = vmatprep.subr.bf16.mxu0 %v2214_v11 }
 0x5d8   :  { %653 = vmatpush1.bf16.msra.mxu0 %v2221_v12 }
 0x5d9   :  { %654 = vmatprep.subr.bf16.mxu0 %v2228_v13 }
 0x5dc   :  { %655 = vmatpush1.bf16.msra.mxu0 %v2236_v14 }
 0x5dd   :  { %792 = vmatprep.subr.bf16.mxu0 %v2183_v3 }
 0x6a2   :  { %v538_v62 = vpop.f32.mrb[8].mxu0 }
 0x6a3   :  { %v545_v63 = vadd.f32 %v538_v62, %v226_v42  ;;  %v540_v0 = vpop.f32.mrb[9].mxu0 }
 0x6a4   :  { %v546_v2 = vadd.f32 %v540_v0, %v227_v53  ;;  %v542_v6 = vpop.f32.mrb[10].mxu0 }
 0x6a5   :  { %v1817_v7 = vmul.f32 -1.442695, %v545_v63  ;;  %v543_v8 = vpop.f32.mrb[11].mxu0 }
 0x6a6   :  { %v1818_v42 = vmul.f32 -1.442695, %v546_v2 }
 0x6a7   :  { %1967 = vpow2.f32 %v1817_v7 }
 0x6a8   :  { %1969 = vtanh.f32 %v546_v2 }
 0x6b1   :  { %v1968_v15 = vpop.eup %1967 }
 0x6b2   :  { %v553_v3 = vadd.f32 1.0, %v1968_v15  ;;  %v1970_v20 = vpop.eup %1969 }
 0x6b4   :  { %1971 = vrcp.f32 %v553_v3 }
 0x6b5   :  { %1973 = vpow2.f32 %v1818_v42 }
 0x6be   :  { %v1972_v57 = vpop.eup %1971 }
 0x6bf   :  { %v561_v22 = vmul.f32 %v1972_v57, %v1970_v20  ;;  %v1974_v25 = vpop.eup %1973  ;;  %v560_v28 = vmul.f32 %v1972_v57, %v494_v35 }
 0x6c0   :  { %v554_v23 = vadd.f32 1.0, %v1974_v25 }
 0x6c1   :  { %563 = vrot.lane.b32.xlu0 %v561_v22, %s2124_s3 }
 0x6c2   :  { %1975 = vrcp.f32 %v554_v23 }
 0x6cc   :  { %v1976_v37 = vpop.eup %1975 }
 0x733   :  { %v564_v34 = vpop.permute.xlu0 %563 }
 0x734   :  { %v566_v53 = vadd.f32 %v564_v34, %v560_v28 }
 0x736   :  { %1977 = vtanh.f32 %v566_v53 }
 0x740   :  { %v1978_v39 = vpop.eup %1977 }
 0x741   :  { %v2487_v41 = vmul.f32 %v1978_v39, %v1976_v37 }
 0x743   :  { %v569_v24 = vpack.c.bf16 %v2487_v41, %v2487_v41 }
 0x745   :  { %571 = vrot.lane.b32.xlu1 %v569_v24, %s2124_s3 }
 0x7b7   :  { %v572_v43 = vpop.permute.xlu1 %571 }
 0x7b8   :  { %1819 = vmatmul.mubr.msk.bf16.vlgmr.msra.gmra.mrb[8].mxu1 %vm284_vm5, %v572_v43 }
 0x7b9   :  { %721 = vmatpush1.bf16.msra.mxu1 %v2189_v5  ;;  %752 = vmatprep.mubr.bf16.mxu1 %v2123_v1 }
 0x7ba   :  { %722 = vmatprep.subr.bf16.mxu1 %v2202_v9 }
 0x7bd   :  { %723 = vmatpush1.bf16.msra.mxu1 %v2208_v10 }
 0x7be   :  { %724 = vmatprep.subr.bf16.mxu1 %v2214_v11 }
 0x7c1   :  { %725 = vmatpush1.bf16.msra.mxu1 %v2221_v12 }
 0x7c2   :  { %726 = vmatprep.subr.bf16.mxu1 %v2228_v13 }
 0x7c5   :  { %727 = vmatpush1.bf16.msra.mxu1 %v2236_v14 }
 0x7c6   :  { %988 = vmatprep.subr.bf16.mxu1 %v1909_v56 }
 0x88b   :  { %v610_v35 = vpop.f32.mrb[8].mxu1 }
 0x88c   :  { %v617_v62 = vadd.f32 %v610_v35, %v228_v46  ;;  %v612_v63 = vpop.f32.mrb[9].mxu1 }
 0x88d   :  { %v618_v0 = vadd.f32 %v612_v63, %v229_v54  ;;  %v614_v2 = vpop.f32.mrb[10].mxu1 }
 0x88e   :  { %v1820_v6 = vmul.f32 -1.442695, %v617_v62  ;;  %v615_v7 = vpop.f32.mrb[11].mxu1 }
 0x88f   :  { %v1821_v27 = vmul.f32 -1.442695, %v618_v0 }
 0x890   :  { %1979 = vpow2.f32 %v1820_v6 }
 0x891   :  { %1981 = vtanh.f32 %v618_v0 }
 0x89a   :  { %v1980_v8 = vpop.eup %1979 }
 0x89b   :  { %v625_v15 = vadd.f32 1.0, %v1980_v8  ;;  %v1982_v3 = vpop.eup %1981 }
 0x89d   :  { %1983 = vrcp.f32 %v625_v15 }
 0x89e   :  { %1985 = vpow2.f32 %v1821_v27 }
 0x8a7   :  { %v1984_v20 = vpop.eup %1983 }
 0x8a8   :  { %v633_v57 = vmul.f32 %v1984_v20, %v1982_v3  ;;  %v1986_v40 = vpop.eup %1985  ;;  %v632_v22 = vmul.f32 %v1984_v20, %v566_v53 }
 0x8a9   :  { %v626_v46 = vadd.f32 1.0, %v1986_v40 }
 0x8aa   :  { %635 = vrot.lane.b32.xlu0 %v633_v57, %s2124_s3 }
 0x8ab   :  { %1987 = vrcp.f32 %v626_v46 }
 0x8b5   :  { %v1988_v54 = vpop.eup %1987 }
 0x91c   :  { %v636_v45 = vpop.permute.xlu0 %635 }
 0x91d   :  { %v638_v47 = vadd.f32 %v636_v45, %v632_v22 }
 0x91f   :  { %1989 = vtanh.f32 %v638_v47 }
 0x929   :  { %v1990_v42 = vpop.eup %1989 }
 0x92a   :  { %v2512_v25 = vmul.f32 %v1990_v42, %v1988_v54 }
 0x92c   :  { %v641_v23 = vpack.c.bf16 %v2512_v25, %v2512_v25  ;;  %v1890_v55 = vpack.i.bf16 %v2512_v25, %v2487_v41  ;;  %v2592_v41 = vld [vmem:[%s2819_s5] ss:$8 sps:$4 sm:$0xff]  }
 0x92e   :  { %643 = vrot.lane.b32.xlu1 %v641_v23, %s2124_s3 }
 0x9a0   :  { %v644_v28 = vpop.permute.xlu1 %643 }
 0x9a1   :  { %1822 = vmatmul.mubr.msk.bf16.vlgmr.msra.gmra.mrb[12].mxu0 %vm284_vm5, %v644_v28 }
 0x9a2   :  { %793 = vmatpush1.bf16.msra.mxu0 %v2189_v5  ;;  %824 = vmatprep.mubr.bf16.mxu0 %v2123_v1 }
 0x9a3   :  { %794 = vmatprep.subr.bf16.mxu0 %v2202_v9 }
 0x9a6   :  { %795 = vmatpush1.bf16.msra.mxu0 %v2208_v10 }
 0x9a7   :  { %796 = vmatprep.subr.bf16.mxu0 %v2214_v11 }
 0x9aa   :  { %797 = vmatpush1.bf16.msra.mxu0 %v2221_v12 }
 0x9ab   :  { %798 = vmatprep.subr.bf16.mxu0 %v2228_v13 }
 0x9ae   :  { %799 = vmatpush1.bf16.msra.mxu0 %v2236_v14 }
 0xa74   :  { %v682_v34 = vpop.f32.mrb[12].mxu0 }
 0xa75   :  { %v689_v5 = vadd.f32 %v682_v34, %v230_v31  ;;  %v684_v53 = vpop.f32.mrb[13].mxu0 }
 0xa76   :  { %v690_v9 = vadd.f32 %v684_v53, %v231_v38  ;;  %v686_v10 = vpop.f32.mrb[14].mxu0 }
 0xa77   :  { %v1823_v11 = vmul.f32 -1.442695, %v689_v5  ;;  %v687_v12 = vpop.f32.mrb[15].mxu0 }
 0xa78   :  { %v1824_v4 = vmul.f32 -1.442695, %v690_v9 }
 0xa79   :  { %1991 = vpow2.f32 %v1823_v11 }
 0xa7a   :  { %1993 = vtanh.f32 %v690_v9 }
 0xa83   :  { %v1992_v13 = vpop.eup %1991 }
 0xa84   :  { %v697_v14 = vadd.f32 1.0, %v1992_v13  ;;  %v1994_v37 = vpop.eup %1993 }
 0xa86   :  { %1995 = vrcp.f32 %v697_v14 }
 0xa87   :  { %1997 = vpow2.f32 %v1824_v4 }
 0xa90   :  { %v1996_v39 = vpop.eup %1995 }
 0xa91   :  { %v705_v24 = vmul.f32 %v1996_v39, %v1994_v37  ;;  %v1998_v17 = vpop.eup %1997  ;;  %v704_v43 = vmul.f32 %v1996_v39, %v638_v47 }
 0xa92   :  { %v698_v31 = vadd.f32 1.0, %v1998_v17 }
 0xa93   :  { %707 = vrot.lane.b32.xlu0 %v705_v24, %s2124_s3 }
 0xa94   :  { %1999 = vrcp.f32 %v698_v31 }
 0xa9e   :  { %v2000_v38 = vpop.eup %1999 }
 0xb05   :  { %v708_v19 = vpop.permute.xlu0 %707 }
 0xb06   :  { %v710_v26 = vadd.f32 %v708_v19, %v704_v43  ;;  %v1916_v19 = vld [vmem:[%s2818_s4 + $0x20] ss:$8 sps:$4 sm:$0xff]  }
 0xb08   :  { %2001 = vtanh.f32 %v710_v26 }
 0xb12   :  { %v2002_v35 = vpop.eup %2001 }
 0xb13   :  { %v712_v62 = vmul.f32 %v2002_v35, %v2000_v38  ;;  %v2605_v38 = vld [vmem:[%s2819_s5 + $0x14] ss:$8 sps:$4 sm:$0xff]   ;;  %v2610_v35 = vld [vmem:[%s2819_s5 + $0x10] ss:$8 sps:$4 sm:$0xff]  }
 0xb15   :  { %v713_v63 = vpack.c.bf16 %v712_v62, %v712_v62  ;;  %v1880_v50 = vpack.i.bf16 %v712_v62, %v2461_v33  ;;  %v2587_v33 = vld [vmem:[%s2819_s5 + $0x4] ss:$8 sps:$4 sm:$0xff]   ;;  %v1924_v62 = vld [vmem:[%s2818_s4 + $0x34] ss:$8 sps:$4 sm:$0xff]  }
 0xb16   :  { %1107 = vmatprep.subr.bf16.mxu0 %v2587_v33 }
 0xb17   :  { %715 = vrot.lane.b32.xlu1 %v713_v63, %s2124_s3 }
 0xb89   :  { %v716_v0 = vpop.permute.xlu1 %715 }
 0xb8a   :  { %1825 = vmatmul.mubr.msk.bf16.vlgmr.msra.gmra.mrb[12].mxu1 %vm284_vm5, %v716_v0  ;;  %v2619_v0 = vld [vmem:[%s2819_s5 + $0x24] ss:$8 sps:$4 sm:$0xff]  }
 0xb8b   :  { %1020 = vmatprep.mubr.bf16.mxu1 %v2123_v1  ;;  %989 = vmatpush1.bf16.msra.mxu1 %v1907_v51 }
 0xc5d   :  { %v754_v2 = vpop.f32.mrb[12].mxu1 }
 0xc5e   :  { %v761_v6 = vadd.f32 %v754_v2, %v232_v49  ;;  %v756_v7 = vpop.f32.mrb[13].mxu1 }
 0xc5f   :  { %v762_v8 = vadd.f32 %v756_v7, %v233_v58  ;;  %v758_v15 = vpop.f32.mrb[14].mxu1  ;;  %v2628_v7 = vld [vmem:[%s2819_s5 + $0x20] ss:$8 sps:$4 sm:$0xff]  }
 0xc60   :  { %v1826_v3 = vmul.f32 -1.442695, %v761_v6  ;;  %v759_v20 = vpop.f32.mrb[15].mxu1  ;;  %v1922_v6 = vld [vmem:[%s2818_s4 + $0x30] ss:$8 sps:$4 sm:$0xff]  }
 0xc61   :  { %v1827_v44 = vmul.f32 -1.442695, %v762_v8  ;;  %v2634_v15 = vld [vmem:[%s2819_s5 + $0x34] ss:$8 sps:$4 sm:$0xff]   ;;  %v2641_v20 = vld [vmem:[%s2819_s5 + $0x30] ss:$8 sps:$4 sm:$0xff]  }
 0xc62   :  { %2003 = vpow2.f32 %v1826_v3 }
 0xc63   :  { %2005 = vtanh.f32 %v762_v8 }
 0xc6c   :  { %v2004_v57 = vpop.eup %2003 }
 0xc6d   :  { %v769_v27 = vadd.f32 1.0, %v2004_v57  ;;  %v2006_v40 = vpop.eup %2005 }
 0xc6f   :  { %2007 = vrcp.f32 %v769_v27 }
 0xc70   :  { %2009 = vpow2.f32 %v1827_v44 }
 0xc79   :  { %v2008_v46 = vpop.eup %2007 }
 0xc7a   :  { %v777_v22 = vmul.f32 %v2008_v46, %v2006_v40  ;;  %v2010_v52 = vpop.eup %2009  ;;  %v776_v45 = vmul.f32 %v2008_v46, %v710_v26  ;;  %v1918_v26 = vld [vmem:[%s2818_s4 + $0x24] ss:$8 sps:$4 sm:$0xff]  }
 0xc7b   :  { %v770_v49 = vadd.f32 1.0, %v2010_v52 }
 0xc7c   :  { %779 = vrot.lane.b32.xlu0 %v777_v22, %s2124_s3 }
 0xc7d   :  { %2011 = vrcp.f32 %v770_v49 }
 0xc87   :  { %v2012_v58 = vpop.eup %2011 }
 0xcee   :  { %v780_v48 = vpop.permute.xlu0 %779 }
 0xcef   :  { %v782_v59 = vadd.f32 %v780_v48, %v776_v45 }
 0xcf1   :  { %2013 = vtanh.f32 %v782_v59 }
 0xcfb   :  { %v2014_v47 = vpop.eup %2013 }
 0xcfc   :  { %v784_v54 = vmul.f32 %v2014_v47, %v2012_v58 }
 0xcfe   :  { %v785_v42 = vpack.c.bf16 %v784_v54, %v784_v54  ;;  %v1875_v23 = vpack.i.bf16 %v784_v54, %v2435_v32 }
 0xd00   :  { %787 = vrot.lane.b32.xlu1 %v785_v42, %s2124_s3 }
 0xd04   :  { %1876 = vrot.lane.b32.xlu1 %v1875_v23, %s2124_s3 }
 0xd72   :  { %v788_v28 = vpop.permute.xlu1 %787 }
 0xd73   :  { %1828 = vmatmul.mubr.msk.bf16.vlgmr.msra.gmra.mrb[16].mxu0 %vm284_vm5, %v788_v28 }
 0xd74   :  { %1139 = vmatprep.mubr.bf16.mxu0 %v2123_v1  ;;  %1108 = vmatpush1.bf16.msra.mxu0 %v2592_v41 }
 0xd75   :  { %1109 = vmatprep.subr.bf16.mxu0 %v2605_v38 }
 0xd76   :  { %v1877_v57 = vpop.permute.xlu1 %1876 }
 0xd77   :  { %v1879_v22 = vunpack.i.h.bf16 %v1877_v57  ;;  %v1878_v44 = vunpack.i.l.bf16 %v1877_v57 }
 0xd78   :  { %1110 = vmatpush1.bf16.msra.mxu0 %v2610_v35 }
 0xd79   :  { %1111 = vmatprep.subr.bf16.mxu0 %v2619_v0  ;;  %v875_v48 = vsel %vm865_vm6, %v1878_v44, %v1879_v22 }
 0xd7c   :  { %1112 = vmatpush1.bf16.msra.mxu0 %v2628_v7 }
 0xd7d   :  { %1113 = vmatprep.subr.bf16.mxu0 %v2634_v15 }
 0xd80   :  { %1114 = vmatpush1.bf16.msra.mxu0 %v2641_v20 }
 0xd81   :  { %1266 = vmatprep.subr.bf16.mxu0 %v2587_v33 }
 0xd83   :  { %1140 = vmatmul.mubr.bf16.vlgmr.msra.gmra.mrb[20].mxu0 %v2123_v1 }
 0xd84   :  { %1267 = vmatpush1.bf16.msra.mxu0 %v2592_v41  ;;  %1298 = vmatprep.mubr.bf16.mxu0 %v2123_v1 }
 0xd85   :  { %1268 = vmatprep.subr.bf16.mxu0 %v2605_v38 }
 0xd88   :  { %1269 = vmatpush1.bf16.msra.mxu0 %v2610_v35 }
 0xd89   :  { %1270 = vmatprep.subr.bf16.mxu0 %v2619_v0 }
 0xd8c   :  { %1271 = vmatpush1.bf16.msra.mxu0 %v2628_v7 }
 0xd8d   :  { %1272 = vmatprep.subr.bf16.mxu0 %v2634_v15 }
 0xd90   :  { %1273 = vmatpush1.bf16.msra.mxu0 %v2641_v20 }
 0xd91   :  { %1438 = vmatprep.subr.bf16.mxu0 %v2587_v33 }
 0xe46   :  { %v826_v34 = vpop.f32.mrb[16].mxu0 }
 0xe47   :  { %v833_v5 = vadd.f32 %v826_v34, %v234_v60  ;;  %v828_v53 = vpop.f32.mrb[17].mxu0  ;;  %v1910_v60 = vld [vmem:[%s2818_s4 + $0x10] ss:$8 sps:$4 sm:$0xff]  }
 0xe48   :  { %v834_v32 = vadd.f32 %v828_v53, %v235_v61  ;;  %v830_v9 = vpop.f32.mrb[18].mxu0  ;;  %v1912_v61 = vld [vmem:[%s2818_s4 + $0x14] ss:$8 sps:$4 sm:$0xff]  }
 0xe49   :  { %v1829_v10 = vmul.f32 -1.442695, %v833_v5  ;;  %v831_v11 = vpop.f32.mrb[19].mxu0  ;;  %990 = vmatprep.subr.bf16.mxu1 %v1912_v61  ;;  %v899_v5 = vrot.slane %v875_v48, 6 }
 0xe4a   :  { %991 = vmatpush1.bf16.msra.mxu1 %v1910_v60  ;;  %v1830_v25 = vmul.f32 -1.442695, %v834_v32 }
 0xe4b   :  { %2015 = vpow2.f32 %v1829_v10  ;;  %992 = vmatprep.subr.bf16.mxu1 %v1918_v26 }
 0xe4c   :  { %2017 = vtanh.f32 %v834_v32 }
 0xe4e   :  { %993 = vmatpush1.bf16.msra.mxu1 %v1916_v19 }
 0xe4f   :  { %994 = vmatprep.subr.bf16.mxu1 %v1924_v62 }
 0xe52   :  { %995 = vmatpush1.bf16.msra.mxu1 %v1922_v6 }
 0xe53   :  { %1180 = vmatprep.subr.bf16.mxu1 %v2587_v33 }
 0xe55   :  { %v2016_v12 = vpop.eup %2015 }
 0xe56   :  { %v841_v13 = vadd.f32 1.0, %v2016_v12  ;;  %v2018_v14 = vpop.eup %2017  ;;  %v1141_v56 = vpop.f32.mrb[20].mxu0 }
 0xe57   :  { %v1143_v60 = vpop.f32.mrb[21].mxu0 }
 0xe58   :  { %2019 = vrcp.f32 %v841_v13  ;;  %v1145_v61 = vpop.f32.mrb[22].mxu0 }
 0xe59   :  { %2021 = vpow2.f32 %v1830_v25  ;;  %v1146_v25 = vpop.f32.mrb[23].mxu0 }
 0xe62   :  { %v2020_v37 = vpop.eup %2019 }
 0xe63   :  { %v849_v39 = vmul.f32 %v2020_v37, %v2018_v14  ;;  %v2022_v24 = vpop.eup %2021  ;;  %v848_v17 = vmul.f32 %v2020_v37, %v782_v59  ;;  %v896_v59 = vsel %vm865_vm6, %v1879_v22, %v1878_v44 }
 0xe64   :  { %v842_v4 = vadd.f32 1.0, %v2022_v24  ;;  %v911_v53 = vrot.slane %v896_v59, 4  ;;  %v933_v24 = vld [vmem:[%s2820_s6] sm:$0x3] }
 0xe65   :  { %851 = vrot.lane.b32.xlu0 %v849_v39, %s2124_s3 }
 0xe66   :  { %2023 = vrcp.f32 %v842_v4  ;;  %v938_v4 = vrot.slane %v933_v24, %v72_v18 }
 0xe69   :  { %1881 = vrot.lane.b32.xlu0 %v1880_v50, %s2124_s3 }
 0xe6d   :  { %1891 = vrot.lane.b32.xlu0 %v1890_v55, %s2124_s3 }
 0xe70   :  { %v2024_v63 = vpop.eup %2023 }
 0xed7   :  { %v852_v31 = vpop.permute.xlu0 %851 }
 0xed8   :  { %v854_v43 = vadd.f32 %v852_v31, %v848_v17  ;;  %v942_v17 = vrot.slane %v933_v24, %v76_v21 }
 0xeda   :  { %2025 = vtanh.f32 %v854_v43 }
 0xee4   :  { %v2026_v2 = vpop.eup %2025 }
 0xee5   :  { %v856_v8 = vmul.f32 %v2026_v2, %v2024_v63 }
 0xee7   :  { %v1885_v3 = vpack.i.bf16 %v856_v8, %v2409_v36  ;;  %v1882_v36 = vpop.permute.xlu0 %1881 }
 0xee8   :  { %v1884_v40 = vunpack.i.h.bf16 %v1882_v36  ;;  %v1883_v46 = vunpack.i.l.bf16 %v1882_v36 }
 0xee9   :  { %1886 = vrot.lane.b32.xlu1 %v1885_v3, %s2124_s3 }
 0xeea   :  { %v895_v45 = vsel %vm865_vm6, %v1884_v40, %v1883_v46  ;;  %v884_v47 = vsel %vm865_vm6, %v1883_v46, %v1884_v40 }
 0xeeb   :  { %v1892_v27 = vpop.permute.xlu0 %1891  ;;  %v908_v54 = vrot.slane %v895_v45, 6  ;;  %v902_v9 = vrot.slane %v884_v47, 4 }
 0xeec   :  { %v1894_v52 = vunpack.i.h.bf16 %v1892_v27  ;;  %v1893_v49 = vunpack.i.l.bf16 %v1892_v27 }
 0xeee   :  { %v894_v58 = vsel %vm865_vm6, %v1894_v52, %v1893_v49  ;;  %v893_v23 = vsel %vm865_vm6, %v1893_v49, %v1894_v52 }
 0xeef   :  { %v921_v32 = vsel %vm93_vm0, %v894_v58, %v908_v54  ;;  %v905_v12 = vrot.slane %v893_v23, 2 }
 0xef0   :  { %v922_v37 = vsel %vm917_vm7, %v921_v32, %v911_v53 }
 0xf5b   :  { %v1887_v42 = vpop.permute.xlu1 %1886 }
 0xf5c   :  { %v1889_v28 = vunpack.i.h.bf16 %v1887_v42  ;;  %v1888_v34 = vunpack.i.l.bf16 %v1887_v42 }
 0xf5e   :  { %v866_v10 = vsel %vm865_vm6, %v1888_v34, %v1889_v28  ;;  %v897_v11 = vsel %vm865_vm6, %v1889_v28, %v1888_v34 }
 0xf5f   :  { %v914_v13 = vrot.slane %v897_v11, 2  ;;  %v916_v14 = vsel %vm93_vm0, %v866_v10, %v899_v5 }
 0xf60   :  { %v918_v39 = vsel %vm917_vm7, %v916_v14, %v902_v9 }
 0xf61   :  { %v923_v50 = vsel %vm919_vm8, %v922_v37, %v914_v13  ;;  %v920_v51 = vsel %vm919_vm8, %v918_v39, %v905_v12 }
 0xf62   :  { %v924_v55 = vpack.c.bf16 %v923_v50, %v920_v51 }
 0xf64   :  { %1839 = vmatmul.mubr.msk.bf16.vlgmr.msra.gmra.mrb[16].mxu1 %vm284_vm5, %v924_v55 }
 0xf65   :  { %1181 = vmatpush1.bf16.msra.mxu1 %v2592_v41  ;;  %1212 = vmatprep.mubr.bf16.mxu1 %v2123_v1 }
 0xf66   :  { %1182 = vmatprep.subr.bf16.mxu1 %v2605_v38 }
 0xf69   :  { %1183 = vmatpush1.bf16.msra.mxu1 %v2610_v35 }
 0xf6a   :  { %1184 = vmatprep.subr.bf16.mxu1 %v2619_v0 }
 0xf6d   :  { %1185 = vmatpush1.bf16.msra.mxu1 %v2628_v7 }
 0xf6e   :  { %1186 = vmatprep.subr.bf16.mxu1 %v2634_v15 }
 0xf71   :  { %1187 = vmatpush1.bf16.msra.mxu1 %v2641_v20 }
 0xf72   :  { %1352 = vmatprep.subr.bf16.mxu1 %v2587_v33 }
0x1037   :  { %v1022_v31 = vpop.f32.mrb[16].mxu1 }
0x1038   :  { %v1023_v43 = vadd.f32 %v1022_v31, %v938_v4  ;;  %v1024_v19 = vpop.f32.mrb[17].mxu1 }
0x1039   :  { %v1025_v26 = vadd.f32 %v1024_v19, %v942_v17  ;;  %v1026_v62 = vpop.f32.mrb[18].mxu1 }
0x103a   :  { %v1027_v63 = vadd.f32 %v1026_v62, %v938_v4  ;;  %v1028_v2 = vpop.f32.mrb[19].mxu1  ;;  %v1047_v6 = vrot.slane %v1023_v43, 6  ;;  %v1053_v8 = vrot.slane %v1023_v43, 2 }
0x103b   :  { %v1029_v3 = vadd.f32 %v1028_v2, %v942_v17  ;;  %v1048_v36 = vrot.slane %v1025_v26, 6  ;;  %v1054_v57 = vrot.slane %v1025_v26, 2 }
0x103c   :  { %v1033_v27 = vrot.slane %v1027_v63, 6  ;;  %v1039_v40 = vrot.slane %v1027_v63, 2  ;;  %v2687_v18 = vsel %vm2270_vm2, %v1027_v63, %v1047_v6  ;;  %v2691_v16 = vsel %vm2270_vm2, %v1027_v63, %v1053_v8 }
0x103d   :  { %v1034_v21 = vrot.slane %v1029_v3, 6  ;;  %v1040_v46 = vrot.slane %v1029_v3, 2  ;;  %v2695_v22 = vsel %vm2274_vm3, %v1029_v3, %v1048_v36  ;;  %v2699_v44 = vsel %vm2274_vm3, %v1029_v3, %v1054_v57 }
0x103e   :  { %v2703_v52 = vsel %vm2270_vm2, %v1023_v43, %v1033_v27  ;;  %v2707_v49 = vsel %vm2270_vm2, %v1023_v43, %v1039_v40 }
0x103f   :  { %v1148_v45 = vadd.f32 %v1141_v56, %v2703_v52  ;;  %v2712_v48 = vsel %vm2274_vm3, %v1025_v26, %v1034_v21  ;;  %v2716_v59 = vsel %vm2274_vm3, %v1025_v26, %v1040_v46 }
0x1040   :  { %v1149_v47 = vadd.f32 %v1143_v60, %v2712_v48 }
0x1041   :  { %v1848_v58 = vmul.f32 -1.442695, %v1148_v45 }
0x1042   :  { %v1849_v34 = vmul.f32 -1.442695, %v1149_v47 }
0x1043   :  { %2027 = vpow2.f32 %v1848_v58 }
0x1044   :  { %2029 = vtanh.f32 %v1149_v47 }
0x104d   :  { %v2028_v54 = vpop.eup %2027 }
0x104e   :  { %v1156_v42 = vadd.f32 1.0, %v2028_v54  ;;  %v2030_v29 = vpop.eup %2029 }
0x1050   :  { %2031 = vrcp.f32 %v1156_v42 }
0x1051   :  { %2033 = vpow2.f32 %v1849_v34 }
0x105a   :  { %v2032_v23 = vpop.eup %2031 }
0x105b   :  { %v1164_v28 = vmul.f32 %v2032_v23, %v2030_v29  ;;  %v2034_v5 = vpop.eup %2033  ;;  %v1163_v30 = vmul.f32 0.0, %v2032_v23 }
0x105c   :  { %v1157_v53 = vadd.f32 1.0, %v2034_v5 }
0x105d   :  { %1166 = vrot.lane.b32.xlu1 %v1164_v28, %s2124_s3 }
0x105e   :  { %2035 = vrcp.f32 %v1157_v53 }
0x1068   :  { %v2036_v10 = vpop.eup %2035 }
0x10cf   :  { %v1167_v32 = vpop.permute.xlu1 %1166 }
0x10d0   :  { %v1169_v9 = vadd.f32 %v1167_v32, %v1163_v30 }
0x10d2   :  { %2037 = vtanh.f32 %v1169_v9  ;;  %v1243_v31 = vrot.slane %v1169_v9, 6 }
0x10dc   :  { %v2038_v11 = vpop.eup %2037 }
0x10dd   :  { %v2720_v12 = vmul.f32 %v2038_v11, %v2036_v10 }
0x10df   :  { %v1173_v13 = vpack.c.bf16 %v2720_v12, %v2720_v12 }
0x10e1   :  { %1175 = vrot.lane.b32.xlu0 %v1173_v13, %s2124_s3 }
0x1153   :  { %v1176_v14 = vpop.permute.xlu0 %1175 }
0x1154   :  { %1850 = vmatmul.mubr.msk.bf16.vlgmr.msra.gmra.mrb[20].mxu1 %vm284_vm5, %v1176_v14 }
0x1155   :  { %1353 = vmatpush1.bf16.msra.mxu1 %v2592_v41  ;;  %1384 = vmatprep.mubr.bf16.mxu1 %v2123_v1 }
0x1156   :  { %1354 = vmatprep.subr.bf16.mxu1 %v2605_v38 }
0x1159   :  { %1355 = vmatpush1.bf16.msra.mxu1 %v2610_v35 }
0x115a   :  { %1356 = vmatprep.subr.bf16.mxu1 %v2619_v0 }
0x115d   :  { %1357 = vmatpush1.bf16.msra.mxu1 %v2628_v7 }
0x115e   :  { %1358 = vmatprep.subr.bf16.mxu1 %v2634_v15 }
0x1161   :  { %1359 = vmatpush1.bf16.msra.mxu1 %v2641_v20 }
0x1162   :  { %1514 = vmatprep.subr.bf16.mxu1 %v2587_v33 }
0x1227   :  { %v1214_v37 = vpop.f32.mrb[20].mxu1 }
0x1228   :  { %v1223_v39 = vrot.slane %v1214_v37, 6  ;;  %v1216_v50 = vpop.f32.mrb[21].mxu1 }
0x1229   :  { %v1218_v51 = vpop.f32.mrb[22].mxu1  ;;  %v1224_v61 = vrot.slane %v1216_v50, 6 }
0x122a   :  { %v1227_v55 = vadd.f32 %v1223_v39, %v2707_v49  ;;  %v1219_v56 = vpop.f32.mrb[23].mxu1 }
0x122b   :  { %v1228_v25 = vadd.f32 %v1224_v61, %v2716_v59 }
0x122c   :  { %v1851_v60 = vmul.f32 -1.442695, %v1227_v55 }
0x122d   :  { %v1852_v62 = vmul.f32 -1.442695, %v1228_v25 }
0x122e   :  { %2039 = vpow2.f32 %v1851_v60 }
0x122f   :  { %2041 = vtanh.f32 %v1228_v25 }
0x1238   :  { %v2040_v24 = vpop.eup %2039 }
0x1239   :  { %v1235_v4 = vadd.f32 1.0, %v2040_v24  ;;  %v2042_v17 = vpop.eup %2041 }
0x123b   :  { %2043 = vrcp.f32 %v1235_v4 }
0x123c   :  { %2045 = vpow2.f32 %v1852_v62 }
0x1245   :  { %v2044_v43 = vpop.eup %2043 }
0x1246   :  { %v1246_v19 = vmul.f32 %v2044_v43, %v2042_v17  ;;  %v1245_v26 = vmul.f32 %v2044_v43, %v1243_v31  ;;  %v2046_v63 = vpop.eup %2045 }
0x1247   :  { %v1236_v2 = vadd.f32 1.0, %v2046_v63 }
0x1248   :  { %1248 = vrot.lane.b32.xlu1 %v1246_v19, %s2124_s3 }
0x1249   :  { %2047 = vrcp.f32 %v1236_v2 }
0x1253   :  { %v2048_v3 = vpop.eup %2047 }
0x12ba   :  { %v1249_v6 = vpop.permute.xlu1 %1248 }
0x12bb   :  { %v1251_v8 = vadd.f32 %v1249_v6, %v1245_v26 }
0x12bd   :  { %2049 = vtanh.f32 %v1251_v8  ;;  %v1329_v30 = vrot.slane %v1251_v8, 6 }
0x12c7   :  { %v2050_v36 = vpop.eup %2049 }
0x12c8   :  { %v1253_v57 = vmul.f32 %v2050_v36, %v2048_v3 }
0x12ca   :  { %v1258_v27 = vpack.c.bf16 %v1253_v57, %v1253_v57  ;;  %v1255_v39 = vrot.slane %v1253_v57, 2 }
0x12cc   :  { %v1260_v40 = vrot.slane %v1258_v27, 1  ;;  %v1257_v55 = vadd.f32 %v1255_v39, %v2720_v12 }
0x12ce   :  { %1261 = vrot.lane.b32.xlu0 %v1260_v40, %s2124_s3 }
0x1340   :  { %v1262_v21 = vpop.permute.xlu0 %1261 }
0x1341   :  { %1853 = vmatmul.mubr.msk.bf16.vlgmr.msra.gmra.mrb[24].mxu0 %vm284_vm5, %v1262_v21 }
0x1342   :  { %1439 = vmatpush1.bf16.msra.mxu0 %v2592_v41  ;;  %1470 = vmatprep.mubr.bf16.mxu0 %v2123_v1 }
0x1343   :  { %1440 = vmatprep.subr.bf16.mxu0 %v2605_v38 }
0x1346   :  { %1441 = vmatpush1.bf16.msra.mxu0 %v2610_v35 }
0x1347   :  { %1442 = vmatprep.subr.bf16.mxu0 %v2619_v0 }
0x134a   :  { %1443 = vmatpush1.bf16.msra.mxu0 %v2628_v7 }
0x134b   :  { %1444 = vmatprep.subr.bf16.mxu0 %v2634_v15 }
0x134e   :  { %1445 = vmatpush1.bf16.msra.mxu0 %v2641_v20 }
0x134f   :  { %1600 = vmatprep.subr.bf16.mxu0 %v2587_v33 }
0x1414   :  { %v1300_v46 = vpop.f32.mrb[24].mxu0 }
0x1415   :  { %v1309_v45 = vrot.slane %v1300_v46, 4  ;;  %v1302_v58 = vpop.f32.mrb[25].mxu0 }
0x1416   :  { %v1304_v47 = vpop.f32.mrb[26].mxu0  ;;  %v1310_v23 = vrot.slane %v1302_v58, 4 }
0x1417   :  { %v1313_v54 = vadd.f32 %v1309_v45, %v2703_v52  ;;  %v1305_v42 = vpop.f32.mrb[27].mxu0 }
0x1418   :  { %v1314_v28 = vadd.f32 %v1310_v23, %v2712_v48 }
0x1419   :  { %v1854_v29 = vmul.f32 -1.442695, %v1313_v54 }
0x141a   :  { %v1855_v11 = vmul.f32 -1.442695, %v1314_v28 }
0x141b   :  { %2051 = vpow2.f32 %v1854_v29 }
0x141c   :  { %2053 = vtanh.f32 %v1314_v28 }
0x1425   :  { %v2052_v34 = vpop.eup %2051 }
0x1426   :  { %v1321_v5 = vadd.f32 1.0, %v2052_v34  ;;  %v2054_v53 = vpop.eup %2053 }
0x1428   :  { %2055 = vrcp.f32 %v1321_v5 }
0x1429   :  { %2057 = vpow2.f32 %v1855_v11 }
0x1432   :  { %v2056_v32 = vpop.eup %2055 }
0x1433   :  { %v1332_v9 = vmul.f32 %v2056_v32, %v2054_v53  ;;  %v1331_v10 = vmul.f32 %v2056_v32, %v1329_v30  ;;  %v2058_v52 = vpop.eup %2057 }
0x1434   :  { %v1322_v13 = vadd.f32 1.0, %v2058_v52 }
0x1435   :  { %1334 = vrot.lane.b32.xlu1 %v1332_v9, %s2124_s3 }
0x1436   :  { %2059 = vrcp.f32 %v1322_v13 }
0x1440   :  { %v2060_v48 = vpop.eup %2059 }
0x14a7   :  { %v1335_v14 = vpop.permute.xlu1 %1334 }
0x14a8   :  { %v1337_v37 = vadd.f32 %v1335_v14, %v1331_v10 }
0x14aa   :  { %2061 = vtanh.f32 %v1337_v37  ;;  %v1415_v3 = vrot.slane %v1337_v37, 6 }
0x14b4   :  { %v2062_v50 = vpop.eup %2061 }
0x14b5   :  { %v1339_v51 = vmul.f32 %v2062_v50, %v2060_v48 }
0x14b7   :  { %v1344_v56 = vpack.c.bf16 %v1339_v51, %v1339_v51  ;;  %v1341_v60 = vrot.slane %v1339_v51, 4 }
0x14b9   :  { %v1346_v61 = vrot.slane %v1344_v56, 2  ;;  %v1343_v25 = vadd.f32 %v1341_v60, %v1257_v55 }
0x14bb   :  { %1347 = vrot.lane.b32.xlu0 %v1346_v61, %s2124_s3 }
0x152d   :  { %v1348_v24 = vpop.permute.xlu0 %1347 }
0x152e   :  { %1856 = vmatmul.mubr.msk.bf16.vlgmr.msra.gmra.mrb[24].mxu1 %vm284_vm5, %v1348_v24 }
0x152f   :  { %1515 = vmatpush1.bf16.msra.mxu1 %v2592_v41  ;;  %1546 = vmatprep.mubr.bf16.mxu1 %v2123_v1 }
0x1530   :  { %1516 = vmatprep.subr.bf16.mxu1 %v2605_v38 }
0x1533   :  { %1517 = vmatpush1.bf16.msra.mxu1 %v2610_v35 }
0x1534   :  { %1518 = vmatprep.subr.bf16.mxu1 %v2619_v0 }
0x1537   :  { %1519 = vmatpush1.bf16.msra.mxu1 %v2628_v7 }
0x1538   :  { %1520 = vmatprep.subr.bf16.mxu1 %v2634_v15 }
0x153b   :  { %1521 = vmatpush1.bf16.msra.mxu1 %v2641_v20 }
0x153c   :  { %1686 = vmatprep.subr.bf16.mxu1 %v2587_v33 }
0x1601   :  { %v1386_v12 = vpop.f32.mrb[24].mxu1 }
0x1602   :  { %v1395_v4 = vrot.slane %v1386_v12, 2  ;;  %v1388_v17 = vpop.f32.mrb[25].mxu1 }
0x1603   :  { %v1390_v31 = vpop.f32.mrb[26].mxu1  ;;  %v1396_v62 = vrot.slane %v1388_v17, 2 }
0x1604   :  { %v1399_v43 = vadd.f32 %v1395_v4, %v2707_v49  ;;  %v1391_v19 = vpop.f32.mrb[27].mxu1 }
0x1605   :  { %v1400_v63 = vadd.f32 %v1396_v62, %v2716_v59 }
0x1606   :  { %v1857_v26 = vmul.f32 -1.442695, %v1399_v43 }
0x1607   :  { %v1858_v27 = vmul.f32 -1.442695, %v1400_v63 }
0x1608   :  { %2063 = vpow2.f32 %v1857_v26 }
0x1609   :  { %2065 = vtanh.f32 %v1400_v63 }
0x1612   :  { %v2064_v2 = vpop.eup %2063 }
0x1613   :  { %v1407_v6 = vadd.f32 1.0, %v2064_v2  ;;  %v2066_v8 = vpop.eup %2065 }
0x1615   :  { %2067 = vrcp.f32 %v1407_v6 }
0x1616   :  { %2069 = vpow2.f32 %v1858_v27 }
0x161f   :  { %v2068_v36 = vpop.eup %2067 }
0x1620   :  { %v1418_v33 = vmul.f32 %v2068_v36, %v2066_v8  ;;  %v1417_v57 = vmul.f32 %v2068_v36, %v1415_v3  ;;  %v2070_v49 = vpop.eup %2069 }
0x1621   :  { %v1408_v40 = vadd.f32 1.0, %v2070_v49 }
0x1622   :  { %1420 = vrot.lane.b32.xlu1 %v1418_v33, %s2124_s3 }
0x1623   :  { %2071 = vrcp.f32 %v1408_v40 }
0x162d   :  { %v2072_v59 = vpop.eup %2071 }
0x1694   :  { %v1421_v21 = vpop.permute.xlu1 %1420 }
0x1695   :  { %v1423_v46 = vadd.f32 %v1421_v21, %v1417_v57 }
0x1697   :  { %2073 = vtanh.f32 %v1423_v46  ;;  %v1495_v13 = vrot.slane %v1423_v46, 6 }
0x16a1   :  { %v2074_v45 = vpop.eup %2073 }
0x16a2   :  { %v1425_v58 = vmul.f32 %v2074_v45, %v2072_v59 }
0x16a4   :  { %v1430_v47 = vpack.c.bf16 %v1425_v58, %v1425_v58  ;;  %v1427_v54 = vrot.slane %v1425_v58, 6 }
0x16a6   :  { %v1432_v42 = vrot.slane %v1430_v47, 3  ;;  %v1429_v29 = vadd.f32 %v1427_v54, %v1343_v25 }
0x16a8   :  { %1433 = vrot.lane.b32.xlu0 %v1432_v42, %s2124_s3 }
0x171a   :  { %v1434_v23 = vpop.permute.xlu0 %1433 }
0x171b   :  { %1859 = vmatmul.mubr.msk.bf16.vlgmr.msra.gmra.mrb[28].mxu0 %vm284_vm5, %v1434_v23 }
0x171c   :  { %1601 = vmatpush1.bf16.msra.mxu0 %v2592_v41  ;;  %1632 = vmatprep.mubr.bf16.mxu0 %v2123_v1 }
0x171d   :  { %1602 = vmatprep.subr.bf16.mxu0 %v2605_v38 }
0x1720   :  { %1603 = vmatpush1.bf16.msra.mxu0 %v2610_v35 }
0x1721   :  { %1604 = vmatprep.subr.bf16.mxu0 %v2619_v0 }
0x1724   :  { %1605 = vmatpush1.bf16.msra.mxu0 %v2628_v7 }
0x1725   :  { %1606 = vmatprep.subr.bf16.mxu0 %v2634_v15 }
0x1728   :  { %1607 = vmatpush1.bf16.msra.mxu0 %v2641_v20 }
0x17ee   :  { %v1472_v28 = vpop.f32.mrb[28].mxu0 }
0x17ef   :  { %v1479_v34 = vadd.f32 %v1472_v28, %v2687_v18  ;;  %v1474_v5 = vpop.f32.mrb[29].mxu0 }
0x17f0   :  { %v1476_v53 = vpop.f32.mrb[30].mxu0  ;;  %v1480_v9 = vadd.f32 %v1474_v5, %v2695_v22 }
0x17f1   :  { %v1860_v30 = vmul.f32 -1.442695, %v1479_v34  ;;  %v1477_v32 = vpop.f32.mrb[31].mxu0 }
0x17f2   :  { %v1861_v39 = vmul.f32 -1.442695, %v1480_v9 }
0x17f3   :  { %2075 = vpow2.f32 %v1860_v30 }
0x17f4   :  { %2077 = vtanh.f32 %v1480_v9 }
0x17fd   :  { %v2076_v10 = vpop.eup %2075 }
0x17fe   :  { %v1487_v11 = vadd.f32 1.0, %v2076_v10  ;;  %v2078_v52 = vpop.eup %2077 }
0x1800   :  { %2079 = vrcp.f32 %v1487_v11 }
0x1801   :  { %2081 = vpow2.f32 %v1861_v39 }
0x180a   :  { %v2080_v14 = vpop.eup %2079 }
0x180b   :  { %v1498_v37 = vmul.f32 %v2080_v14, %v2078_v52  ;;  %v1497_v48 = vmul.f32 %v2080_v14, %v1495_v13  ;;  %v2082_v50 = vpop.eup %2081 }
0x180c   :  { %v1488_v51 = vadd.f32 1.0, %v2082_v50 }
0x180d   :  { %1500 = vrot.lane.b32.xlu1 %v1498_v37, %s2124_s3 }
0x180e   :  { %2083 = vrcp.f32 %v1488_v51 }
0x1818   :  { %v2084_v60 = vpop.eup %2083 }
0x187f   :  { %v1501_v55 = vpop.permute.xlu1 %1500 }
0x1880   :  { %v1503_v56 = vadd.f32 %v1501_v55, %v1497_v48 }
0x1882   :  { %2085 = vtanh.f32 %v1503_v56 }
0x188c   :  { %v2086_v61 = vpop.eup %2085 }
0x188d   :  { %v1505_v25 = vmul.f32 %v2086_v61, %v2084_v60 }
0x188f   :  { %v1507_v24 = vpack.c.bf16 %v1505_v25, %v1505_v25  ;;  %v1506_v12 = vadd.f32 %v1505_v25, %v1429_v29  ;;  %v1871_v25 = vld [vmem:[%s2821_s7] ss:$0 sm:$0xff] }
0x1891   :  { %1509 = vrot.lane.b32.xlu0 %v1507_v24, %s2124_s3 }
0x1903   :  { %v1510_v4 = vpop.permute.xlu0 %1509 }
0x1904   :  { %1862 = vmatmul.mubr.msk.bf16.vlgmr.msra.gmra.mrb[28].mxu1 %vm284_vm5, %v1510_v4 }
0x1905   :  { %1687 = vmatpush1.bf16.msra.mxu1 %v2592_v41  ;;  %1718 = vmatprep.mubr.bf16.mxu1 %v2123_v1 }
0x1906   :  { %1688 = vmatprep.subr.bf16.mxu1 %v2605_v38 }
0x1909   :  { %1689 = vmatpush1.bf16.msra.mxu1 %v2610_v35 }
0x190a   :  { %1690 = vmatprep.subr.bf16.mxu1 %v2619_v0 }
0x190d   :  { %1691 = vmatpush1.bf16.msra.mxu1 %v2628_v7 }
0x190e   :  { %1692 = vmatprep.subr.bf16.mxu1 %v2634_v15  ;;  %v1577_v15 = vrot.slane %v1503_v56, 6 }
0x1911   :  { %1693 = vmatpush1.bf16.msra.mxu1 %v2641_v20 }
0x19d7   :  { %v1548_v17 = vpop.f32.mrb[28].mxu1 }
0x19d8   :  { %v1557_v31 = vrot.slane %v1548_v17, 6  ;;  %v1550_v43 = vpop.f32.mrb[29].mxu1 }
0x19d9   :  { %v1552_v19 = vpop.f32.mrb[30].mxu1  ;;  %v1558_v38 = vrot.slane %v1550_v43, 6 }
0x19da   :  { %v1561_v41 = vadd.f32 %v1557_v31, %v2691_v16  ;;  %v1553_v26 = vpop.f32.mrb[31].mxu1 }
0x19db   :  { %v1562_v35 = vadd.f32 %v1558_v38, %v2699_v44 }
0x19dc   :  { %v1863_v1 = vmul.f32 -1.442695, %v1561_v41 }
0x19dd   :  { %v1864_v6 = vmul.f32 -1.442695, %v1562_v35 }
0x19de   :  { %2087 = vpow2.f32 %v1863_v1 }
0x19df   :  { %2089 = vtanh.f32 %v1562_v35 }
0x19e8   :  { %v2088_v62 = vpop.eup %2087 }
0x19e9   :  { %v1569_v0 = vadd.f32 1.0, %v2088_v62  ;;  %v2090_v7 = vpop.eup %2089 }
0x19eb   :  { %2091 = vrcp.f32 %v1569_v0 }
0x19ec   :  { %2093 = vpow2.f32 %v1864_v6 }
0x19f5   :  { %v2092_v63 = vpop.eup %2091 }
0x19f6   :  { %v1580_v20 = vmul.f32 %v2092_v63, %v2090_v7  ;;  %v1579_v2 = vmul.f32 %v2092_v63, %v1577_v15  ;;  %v2094_v8 = vpop.eup %2093 }
0x19f7   :  { %v1570_v3 = vadd.f32 1.0, %v2094_v8 }
0x19f8   :  { %1582 = vrot.lane.b32.xlu1 %v1580_v20, %s2124_s3 }
0x19f9   :  { %2095 = vrcp.f32 %v1570_v3  ;;  %v14_v3 = vstv %s2822_s8 }
0x19fa   :  { %15 = vst [vmem:[#allocation2] sm:$0x1] %v14_v3 }
0x1a03   :  { %v2096_v57 = vpop.eup %2095 }
0x1a6a   :  { %v1583_v36 = vpop.permute.xlu1 %1582 }
0x1a6b   :  { %v1585_v33 = vadd.f32 %v1583_v36, %v1579_v2 }
0x1a6d   :  { %2097 = vtanh.f32 %v1585_v33  ;;  %v1663_v9 = vrot.slane %v1585_v33, 6 }
0x1a77   :  { %v2098_v27 = vpop.eup %2097 }
0x1a78   :  { %v1587_v49 = vmul.f32 %v2098_v27, %v2096_v57 }
0x1a7a   :  { %v1592_v40 = vpack.c.bf16 %v1587_v49, %v1587_v49  ;;  %v1589_v21 = vrot.slane %v1587_v49, 2 }
0x1a7c   :  { %v1594_v46 = vrot.slane %v1592_v40, 1  ;;  %v1591_v59 = vadd.f32 %v1589_v21, %v1506_v12 }
0x1a7e   :  { %1595 = vrot.lane.b32.xlu0 %v1594_v46, %s2124_s3 }
0x1af0   :  { %v1596_v45 = vpop.permute.xlu0 %1595 }
0x1af1   :  { %1865 = vmatmul.mubr.msk.bf16.vlgmr.msra.gmra.mrb[32].mxu0 %vm284_vm5, %v1596_v45 }
0x1bc4   :  { %v1634_v58 = vpop.f32.mrb[32].mxu0 }
0x1bc5   :  { %v1643_v47 = vrot.slane %v1634_v58, 4  ;;  %v1636_v54 = vpop.f32.mrb[33].mxu0 }
0x1bc6   :  { %v1638_v42 = vpop.f32.mrb[34].mxu0  ;;  %v1644_v34 = vrot.slane %v1636_v54, 4 }
0x1bc7   :  { %v1647_v29 = vadd.f32 %v1643_v47, %v2687_v18  ;;  %v1639_v23 = vpop.f32.mrb[35].mxu0 }
0x1bc8   :  { %v1648_v5 = vadd.f32 %v1644_v34, %v2695_v22 }
0x1bc9   :  { %v1866_v28 = vmul.f32 -1.442695, %v1647_v29 }
0x1bca   :  { %v1867_v13 = vmul.f32 -1.442695, %v1648_v5 }
0x1bcb   :  { %2099 = vpow2.f32 %v1866_v28 }
0x1bcc   :  { %2101 = vtanh.f32 %v1648_v5 }
0x1bd5   :  { %v2100_v53 = vpop.eup %2099 }
0x1bd6   :  { %v1655_v30 = vadd.f32 1.0, %v2100_v53  ;;  %v2102_v32 = vpop.eup %2101 }
0x1bd8   :  { %2103 = vrcp.f32 %v1655_v30 }
0x1bd9   :  { %2105 = vpow2.f32 %v1867_v13 }
0x1be2   :  { %v2104_v10 = vpop.eup %2103 }
0x1be3   :  { %v1666_v11 = vmul.f32 %v2104_v10, %v2102_v32  ;;  %v1665_v52 = vmul.f32 %v2104_v10, %v1663_v9  ;;  %v2106_v18 = vpop.eup %2105 }
0x1be4   :  { %v1656_v14 = vadd.f32 1.0, %v2106_v18 }
0x1be5   :  { %1668 = vrot.lane.b32.xlu1 %v1666_v11, %s2124_s3 }
0x1be6   :  { %2107 = vrcp.f32 %v1656_v14 }
0x1bf0   :  { %v2108_v22 = vpop.eup %2107 }
0x1c57   :  { %v1669_v37 = vpop.permute.xlu1 %1668 }
0x1c58   :  { %v1671_v48 = vadd.f32 %v1669_v37, %v1665_v52 }
0x1c5a   :  { %2109 = vtanh.f32 %v1671_v48  ;;  %v1749_v62 = vrot.slane %v1671_v48, 6 }
0x1c64   :  { %v2110_v39 = vpop.eup %2109 }
0x1c65   :  { %v1673_v50 = vmul.f32 %v2110_v39, %v2108_v22 }
0x1c67   :  { %v1678_v51 = vpack.c.bf16 %v1673_v50, %v1673_v50  ;;  %v1675_v55 = vrot.slane %v1673_v50, 4 }
0x1c69   :  { %v1680_v56 = vrot.slane %v1678_v51, 2  ;;  %v1677_v60 = vadd.f32 %v1675_v55, %v1591_v59  ;;  %v1872_v59 = vld [vmem:[#allocation2] ss:$0 sm:$0xff] }
0x1c6b   :  { %1681 = vrot.lane.b32.xlu0 %v1680_v56, %s2124_s3 }
0x1c6f   :  { %1771 = vrot.lane.b32.xlu0 %v1871_v25, %s2124_s3 }
0x1cdd   :  { %v1682_v61 = vpop.permute.xlu0 %1681 }
0x1cde   :  { %1868 = vmatmul.mubr.msk.bf16.vlgmr.msra.gmra.mrb[32].mxu1 %vm284_vm5, %v1682_v61 }
0x1ce1   :  { %v1772_v27 = vpop.permute.xlu0 %1771 }
0x1db1   :  { %v1720_v24 = vpop.f32.mrb[32].mxu1 }
0x1db2   :  { %v1729_v12 = vrot.slane %v1720_v24, 2  ;;  %v1722_v4 = vpop.f32.mrb[33].mxu1 }
0x1db3   :  { %v1724_v17 = vpop.f32.mrb[34].mxu1  ;;  %v1730_v41 = vrot.slane %v1722_v4, 2 }
0x1db4   :  { %v1733_v31 = vadd.f32 %v1729_v12, %v2691_v16  ;;  %v1725_v43 = vpop.f32.mrb[35].mxu1 }
0x1db5   :  { %v1734_v26 = vadd.f32 %v1730_v41, %v2699_v44 }
0x1db6   :  { %v1869_v19 = vmul.f32 -1.442695, %v1733_v31 }
0x1db7   :  { %v1870_v63 = vmul.f32 -1.442695, %v1734_v26 }
0x1db8   :  { %2111 = vpow2.f32 %v1869_v19 }
0x1db9   :  { %2113 = vtanh.f32 %v1734_v26 }
0x1dc2   :  { %v2112_v1 = vpop.eup %2111 }
0x1dc3   :  { %v1741_v38 = vadd.f32 1.0, %v2112_v1  ;;  %v2114_v35 = vpop.eup %2113 }
0x1dc5   :  { %2115 = vrcp.f32 %v1741_v38 }
0x1dc6   :  { %2117 = vpow2.f32 %v1870_v63 }
0x1dcf   :  { %v2116_v0 = vpop.eup %2115 }
0x1dd0   :  { %v1752_v7 = vmul.f32 %v2116_v0, %v2114_v35  ;;  %v1751_v15 = vmul.f32 %v2116_v0, %v1749_v62  ;;  %v2118_v16 = vpop.eup %2117 }
0x1dd1   :  { %v1742_v20 = vadd.f32 1.0, %v2118_v16 }
0x1dd2   :  { %1754 = vrot.lane.b32.xlu1 %v1752_v7, %s2124_s3 }
0x1dd3   :  { %2119 = vrcp.f32 %v1742_v20 }
0x1ddd   :  { %v2120_v44 = vpop.eup %2119 }
0x1e44   :  { %v1755_v2 = vpop.permute.xlu1 %1754 }
0x1e45   :  { %v1757_v6 = vadd.f32 %v1755_v2, %v1751_v15 }
0x1e47   :  { %2121 = vtanh.f32 %v1757_v6 }
0x1e51   :  { %v2122_v8 = vpop.eup %2121 }
0x1e52   :  { %v1759_v36 = vmul.f32 %v2122_v8, %v2120_v44 }
0x1e54   :  { %v1761_v33 = vrot.slane %v1759_v36, 6 }
0x1e56   :  { %v1763_v57 = vadd.f32 %v1761_v33, %v1677_v60 }
0x1e58   :  { %v1764_v49 = vmul.f32 0.125, %v1763_v57 }
0x1e5a   :  { %v1774_v40 = vmul.f32 %v1772_v27, %v1764_v49 }
0x1e5c   :  { %1776 = vrot.lane.b32.xlu1 %v1774_v40, %s2124_s3 }
0x1ece   :  { %v1777_v21 = vpop.permute.xlu1 %1776 }
0x1ecf   :  { %v1780_v46 = vsel %vm1779_vm9, %v1777_v21, 0.0 }
0x1ed0   :  { %1781 = vadd.xlane.f32.xlu0 %v1780_v46 }
0x1f5d   :  { %v1782_v45 = vpop.xlane.xlu0 %1781 }
0x1f5e   :  { %v1790_v58 = vadd.f32 %v1872_v59, %v1782_v45 }
0x1f60   :  { %1792 = vst.msk [vmem:[%s2823_s9] sm:$0x3] %vm1791_vm10, %v1790_v58 }

</bundles_post_ra>
